<compile_context>
chip_gen: v7x
topology: tpu7x:2x2x1
jax: 0.10.0
libtpu: 0.0.40
codegen_flags: <defaults>
</compile_context>

<pallas_src>
import jax
import jax.numpy as jnp
from jax.experimental import pallas as pl
from jax.experimental.pallas import tpu as pltpu

EPS = 1e-5
IN_FEATURES = 28 * 28          # 784
PAD_IN = 896                   # 7 * 128  (zero-padded K for the first matmul)
NUM_CLASSES = 10
OUT_PAD = 128                  # lane-dense output width (sliced to 10 outside)
LAYER_DIMS = [(IN_FEATURES, 256), (256, 128), (128, 32), (32, NUM_CLASSES)]
TB_CAP = 512                   # max batch-tile rows


def _round_up(x, m):
    return (x + m - 1) // m * m


def _cdiv(a, b):
    return -(-a // b)


# --------------------------------------------------------------------------
# Kernel: 4x (bf16 matmul, f32 accumulate, bias, ReLU) + stable softmax.
# --------------------------------------------------------------------------
def fc_kernel(x_ref, w1_ref, w2_ref, w3_ref, w4_ref, bias_ref, o_ref):
    # Packed biases (f32): row k holds layer-k bias. Row 3 lanes >= 10 are
    # -1e30 so the padded logit lanes vanish under the softmax.
    b1 = bias_ref[0:1, :]                 # [1, 256]
    b2 = bias_ref[1:2, 0:128]             # [1, 128]
    b3 = bias_ref[2:3, 0:32]              # [1, 32]
    b4 = bias_ref[3:4, 0:OUT_PAD]         # [1, 128]

    # x_ref is already bf16 [TB, 896]; BN1 + channel mix folded on the host.
    h = jnp.dot(x_ref[...], w1_ref[...], preferred_element_type=jnp.float32) + b1
    h = jnp.maximum(h, 0.0)
    h = jnp.dot(h.astype(jnp.bfloat16), w2_ref[...],
                preferred_element_type=jnp.float32) + b2
    h = jnp.maximum(h, 0.0)
    h = jnp.dot(h.astype(jnp.bfloat16), w3_ref[...],
                preferred_element_type=jnp.float32) + b3
    h = jnp.maximum(h, 0.0)
    logits = jnp.dot(h.astype(jnp.bfloat16), w4_ref[...],
                     preferred_element_type=jnp.float32) + b4   # [TB, 128]

    # Numerically stable softmax over the full 128-lane vreg; the divide goes
    # to the EUP via the approximate reciprocal.
    z = logits - jnp.max(logits, axis=-1, keepdims=True)
    e = jnp.exp(z)
    denom = jnp.sum(e, axis=-1, keepdims=True)
    o_ref[...] = e * pl.reciprocal(denom, approx=True)


# --------------------------------------------------------------------------
# Host-side parameter construction and folding.
# --------------------------------------------------------------------------
def make_params(key):
    """Raw module-equivalent params: per layer (bn_scale, bn_shift, W[in,out], b[out]).

    Linear(in, out): W, b ~ U(-1/sqrt(in), 1/sqrt(in)) (W stored transposed).
    BatchNorm1d (fresh module, eval mode): gamma=1, beta=0, mean=0, var=1,
    folded to scale s = gamma/sqrt(var+eps), shift t = beta - mean*s.
    """
    params = []
    for fan_in, fan_out in LAYER_DIMS:
        key, kw, kb = jax.random.split(key, 3)
        bound = 1.0 / float(fan_in) ** 0.5
        W = jax.random.uniform(kw, (fan_in, fan_out), jnp.float32, -bound, bound)
        b = jax.random.uniform(kb, (fan_out,), jnp.float32, -bound, bound)
        gamma = jnp.ones((fan_in,), jnp.float32)
        beta = jnp.zeros((fan_in,), jnp.float32)
        running_mean = jnp.zeros((fan_in,), jnp.float32)
        running_var = jnp.ones((fan_in,), jnp.float32)
        s = gamma / jnp.sqrt(running_var + EPS)
        t = beta - running_mean * s
        params.append((s, t, W, b))
    return params


def fold_params(params):
    """Fold eval-mode BN into bf16 weights + a packed f32 bias buffer.

    Layer k: y = (h*s + t) @ W + b = h @ (diag(s) @ W) + (t @ W + b).
    W1 is zero-padded 784 -> 896 rows; W4 is zero-padded 10 -> 128 cols and the
    padded bias lanes are set to -1e30 (softmax mask).
    """
    (s1, t1, W1, b1), rest = params[0], params[1:]

    W1f = s1[:, None] * W1                                       # [784, 256]
    W1f = jnp.pad(W1f, ((0, PAD_IN - IN_FEATURES), (0, 0)))      # [896, 256]
    folded_w = [W1f]
    folded_b = [t1 @ W1 + b1]
    for (s, t, W, b) in rest:
        folded_w.append(s[:, None] * W)
        folded_b.append(t @ W + b)

    # Lane-dense final layer: [32, 10] -> [32, 128] (zero columns).
    folded_w[3] = jnp.pad(folded_w[3], ((0, 0), (0, OUT_PAD - NUM_CLASSES)))

    bias_pack = jnp.zeros((4, 256), jnp.float32)
    for k, bk in enumerate(folded_b):
        bias_pack = bias_pack.at[k, :bk.shape[0]].set(bk)
    bias_pack = bias_pack.at[3, NUM_CLASSES:OUT_PAD].set(-1e30)  # softmax mask

    weights = [w.astype(jnp.bfloat16) for w in folded_w]
    return weights, bias_pack


# --------------------------------------------------------------------------
# Wrapper.
# --------------------------------------------------------------------------
def _build_call(TB, n_tiles, B_pad, weights, bias_pack, single_buffer_consts):
    # Constant blocks (weights / biases): block index never changes, so a
    # single VMEM buffer suffices; default is double-buffered.
    const_kw = {"pipeline_mode": pl.Buffered(1)} if single_buffer_consts else {}
    w_specs = [pl.BlockSpec(w.shape, lambda i: (0, 0), **const_kw) for w in weights]
    bias_spec = pl.BlockSpec(bias_pack.shape, lambda i: (0, 0), **const_kw)

    return pl.pallas_call(
        fc_kernel,
        out_shape=jax.ShapeDtypeStruct((B_pad, OUT_PAD), jnp.float32),
        grid_spec=pltpu.PrefetchScalarGridSpec(
            num_scalar_prefetch=0,
            grid=(n_tiles,),
            in_specs=[pl.BlockSpec((TB, PAD_IN), lambda i: (i, 0))]
                     + w_specs + [bias_spec],
            out_specs=pl.BlockSpec((TB, OUT_PAD), lambda i: (i, 0)),
        ),
        compiler_params=pltpu.CompilerParams(
            dimension_semantics=("parallel",),
            # Explicit budget so TB=512 tiles also fit under v5e's 16 MiB
            # default scoped-VMEM limit; well under v7x's 64 MiB physical VMEM.
            vmem_limit_bytes=32 * 1024 * 1024,
        ),
    )


def fc_forward(x, folded):
    weights, bias_pack = folded
    B, C, H, W = x.shape
    assert H * W == IN_FEATURES, "Linear(28*28, 256) requires 28x28 spatial input"
    assert C == 1 or C >= 3, "channel mix needs exactly 1 or >=3 channels"

    # Channel mix in the wrapper (3 -> 1 reduction; shrinks the kernel's x
    # stream and the layer-1 K dimension by 3x). Channels beyond the first 3
    # are ignored, matching the torch forward.
    if C > 1:
        g = 0.299 * x[:, 0] + 0.587 * x[:, 1] + 0.114 * x[:, 2]
    else:
        g = x[:, 0]
    x2 = g.reshape(B, IN_FEATURES).astype(jnp.bfloat16)   # bf16 DMA stream

    # Batch tiling: sublane-aligned tiles up to TB_CAP rows; for large batches
    # force >= 2 grid steps so the "parallel" axis can use both v7x TensorCores.
    B_al = _round_up(B, 8)
    n_tiles = max(1, _cdiv(B_al, TB_CAP))
    if n_tiles == 1 and B_al >= 256:
        n_tiles = 2
    TB = _round_up(_cdiv(B_al, n_tiles), 8)
    B_pad = n_tiles * TB

    # One fused pad: batch rows -> B_pad, feature dim 784 -> 896 (7*128).
    x2 = jnp.pad(x2, ((0, B_pad - B), (0, PAD_IN - IN_FEATURES)))

    try:
        out = _build_call(TB, n_tiles, B_pad, weights, bias_pack,
                          single_buffer_consts=True)(x2, *weights, bias_pack)
    except Exception:
        # pl.Buffered(1) not supported by this jax build / backend: fall back
        # to default (double) buffering for the constant blocks.
        out = _build_call(TB, n_tiles, B_pad, weights, bias_pack,
                          single_buffer_consts=False)(x2, *weights, bias_pack)

    return out[:B, :NUM_CLASSES]


def fc_reference(x, params):
    """Pure-JAX f32 reference with the original (unfolded) module math."""
    B, C, _, _ = x.shape
    if C > 1:
        g = 0.299 * x[:, 0] + 0.587 * x[:, 1] + 0.114 * x[:, 2]
    else:
        g = x[:, 0]
    h = g.reshape(B, -1).astype(jnp.float32)
    for idx, (s, t, W, b) in enumerate(params):
        h = h * s + t
        h = h @ W + b
        if idx < len(params) - 1:
            h = jnp.maximum(h, 0.0)
    return jax.nn.softmax(h, axis=-1)


if __name__ == "__main__":
    key = jax.random.PRNGKey(0)
    k_x, k_p = jax.random.split(key)

    # Small batch of RGB 28x28 images (NCHW), matching the torch forward.
    x = jax.random.normal(k_x, (8, 3, 28, 28), dtype=jnp.float32)
    params = make_params(k_p)
    folded = fold_params(params)

    out = fc_forward(x, folded)
    out = jax.block_until_ready(out)

    assert out.shape == (8, 10)
    # Softmax rows should sum to ~1 (approx reciprocal on the EUP).
    assert bool(jnp.allclose(jnp.sum(out, axis=-1), 1.0, atol=1e-2))
    # Parity with the f32 reference (bf16 weights/activations -> loose tol).
    ref = fc_reference(x, params)
    max_err = float(jnp.max(jnp.abs(out - ref)))
    assert max_err < 3e-2, max_err
    print("KERNEL_OK")
</pallas_src>

<mosaic_0001>
module attributes {stable_mosaic.version = 11 : i64} {
  func.func @fc_kernel(%arg0: i32, %arg1: memref<8x896xbf16, #tpu.memory_space<vmem>>, %arg2: memref<896x256xbf16, #tpu.memory_space<vmem>>, %arg3: memref<256x128xbf16, #tpu.memory_space<vmem>>, %arg4: memref<128x32xbf16, #tpu.memory_space<vmem>>, %arg5: memref<32x128xbf16, #tpu.memory_space<vmem>>, %arg6: memref<4x256xf32, #tpu.memory_space<vmem>>, %arg7: memref<8x128xf32, #tpu.memory_space<vmem>>) attributes {dimension_semantics = [#tpu.dimension_semantics<parallel>], iteration_bounds = array<i64: 1>, scalar_prefetch = 0 : i64, scratch_operands = 0 : i64, tpu.core_type = #tpu.core_type<tc>, window_params = [{transform_indices = @transform_0, window_bounds = array<i64: 8, 896>}, {pipeline_mode = #tpu.pipeline_mode<synchronous>, transform_indices = @transform_1, window_bounds = array<i64: 896, 256>}, {pipeline_mode = #tpu.pipeline_mode<synchronous>, transform_indices = @transform_2, window_bounds = array<i64: 256, 128>}, {pipeline_mode = #tpu.pipeline_mode<synchronous>, transform_indices = @transform_3, window_bounds = array<i64: 128, 32>}, {pipeline_mode = #tpu.pipeline_mode<synchronous>, transform_indices = @transform_4, window_bounds = array<i64: 32, 128>}, {pipeline_mode = #tpu.pipeline_mode<synchronous>, transform_indices = @transform_5, window_bounds = array<i64: 4, 256>}, {transform_indices = @transform_6, window_bounds = array<i64: 8, 128>}]} {
    %c0 = arith.constant 0 : index
    %c0_0 = arith.constant 0 : index
    %0 = vector.load %arg6[%c0, %c0_0] : memref<4x256xf32, #tpu.memory_space<vmem>>, vector<1x256xf32>
    %c1 = arith.constant 1 : index
    %c0_1 = arith.constant 0 : index
    %1 = vector.load %arg6[%c1, %c0_1] : memref<4x256xf32, #tpu.memory_space<vmem>>, vector<1x128xf32>
    %c2 = arith.constant 2 : index
    %c0_2 = arith.constant 0 : index
    %2 = vector.load %arg6[%c2, %c0_2] : memref<4x256xf32, #tpu.memory_space<vmem>>, vector<1x32xf32>
    %c3 = arith.constant 3 : index
    %c0_3 = arith.constant 0 : index
    %3 = vector.load %arg6[%c3, %c0_3] : memref<4x256xf32, #tpu.memory_space<vmem>>, vector<1x128xf32>
    %c0_4 = arith.constant 0 : index
    %c0_5 = arith.constant 0 : index
    %4 = vector.load %arg1[%c0_4, %c0_5] : memref<8x896xbf16, #tpu.memory_space<vmem>>, vector<8x896xbf16>
    %c0_6 = arith.constant 0 : index
    %c0_7 = arith.constant 0 : index
    %5 = vector.load %arg2[%c0_6, %c0_7] : memref<896x256xbf16, #tpu.memory_space<vmem>>, vector<896x256xbf16>
    %cst = arith.constant dense<0.000000e+00> : vector<8x256xf32>
    %6 = tpu.matmul %4, %5, %cst {dimension_numbers = #tpu.dot_dimension_numbers<[1], [0], [0], [1], [0, 0, 1, 1], [], []>} : vector<8x896xbf16>, vector<896x256xbf16>, vector<8x256xf32> -> vector<8x256xf32>
    %7 = vector.broadcast %0 : vector<1x256xf32> to vector<8x256xf32>
    %8 = arith.addf %6, %7 : vector<8x256xf32>
    %cst_8 = arith.constant 0.000000e+00 : f32
    %9 = vector.broadcast %cst_8 : f32 to vector<8x256xf32>
    %10 = arith.maximumf %8, %9 : vector<8x256xf32>
    %11 = arith.truncf %10 : vector<8x256xf32> to vector<8x256xbf16>
    %c0_9 = arith.constant 0 : index
    %c0_10 = arith.constant 0 : index
    %12 = vector.load %arg3[%c0_9, %c0_10] : memref<256x128xbf16, #tpu.memory_space<vmem>>, vector<256x128xbf16>
    %cst_11 = arith.constant dense<0.000000e+00> : vector<8x128xf32>
    %13 = tpu.matmul %11, %12, %cst_11 {dimension_numbers = #tpu.dot_dimension_numbers<[1], [0], [0], [1], [0, 0, 1, 1], [], []>} : vector<8x256xbf16>, vector<256x128xbf16>, vector<8x128xf32> -> vector<8x128xf32>
    %14 = vector.broadcast %1 : vector<1x128xf32> to vector<8x128xf32>
    %15 = arith.addf %13, %14 : vector<8x128xf32>
    %cst_12 = arith.constant 0.000000e+00 : f32
    %16 = vector.broadcast %cst_12 : f32 to vector<8x128xf32>
    %17 = arith.maximumf %15, %16 : vector<8x128xf32>
    %18 = arith.truncf %17 : vector<8x128xf32> to vector<8x128xbf16>
    %c0_13 = arith.constant 0 : index
    %c0_14 = arith.constant 0 : index
    %19 = vector.load %arg4[%c0_13, %c0_14] : memref<128x32xbf16, #tpu.memory_space<vmem>>, vector<128x32xbf16>
    %cst_15 = arith.constant dense<0.000000e+00> : vector<8x32xf32>
    %20 = tpu.matmul %18, %19, %cst_15 {dimension_numbers = #tpu.dot_dimension_numbers<[1], [0], [0], [1], [0, 0, 1, 1], [], []>} : vector<8x128xbf16>, vector<128x32xbf16>, vector<8x32xf32> -> vector<8x32xf32>
    %21 = vector.broadcast %2 : vector<1x32xf32> to vector<8x32xf32>
    %22 = arith.addf %20, %21 : vector<8x32xf32>
    %cst_16 = arith.constant 0.000000e+00 : f32
    %23 = vector.broadcast %cst_16 : f32 to vector<8x32xf32>
    %24 = arith.maximumf %22, %23 : vector<8x32xf32>
    %25 = arith.truncf %24 : vector<8x32xf32> to vector<8x32xbf16>
    %c0_17 = arith.constant 0 : index
    %c0_18 = arith.constant 0 : index
    %26 = vector.load %arg5[%c0_17, %c0_18] : memref<32x128xbf16, #tpu.memory_space<vmem>>, vector<32x128xbf16>
    %cst_19 = arith.constant dense<0.000000e+00> : vector<8x128xf32>
    %27 = tpu.matmul %25, %26, %cst_19 {dimension_numbers = #tpu.dot_dimension_numbers<[1], [0], [0], [1], [0, 0, 1, 1], [], []>} : vector<8x32xbf16>, vector<32x128xbf16>, vector<8x128xf32> -> vector<8x128xf32>
    %28 = vector.broadcast %3 : vector<1x128xf32> to vector<8x128xf32>
    %29 = arith.addf %27, %28 : vector<8x128xf32>
    %cst_20 = arith.constant dense<0xFF800000> : vector<8xf32>
    %30 = vector.multi_reduction <maximumf>, %29, %cst_20 [1] : vector<8x128xf32> to vector<8xf32>
    %31 = vector.shape_cast %30 : vector<8xf32> to vector<8x1xf32>
    %32 = vector.broadcast %31 : vector<8x1xf32> to vector<8x128xf32>
    %33 = arith.subf %29, %32 : vector<8x128xf32>
    %34 = math.exp %33 : vector<8x128xf32>
    %cst_21 = arith.constant dense<0.000000e+00> : vector<8xf32>
    %35 = vector.multi_reduction <add>, %34, %cst_21 [1] : vector<8x128xf32> to vector<8xf32>
    %36 = vector.shape_cast %35 : vector<8xf32> to vector<8x1xf32>
    %37 = tpu.reciprocal %36 {approx = true} : vector<8x1xf32> -> vector<8x1xf32>
    %38 = vector.broadcast %37 : vector<8x1xf32> to vector<8x128xf32>
    %39 = arith.mulf %34, %38 : vector<8x128xf32>
    %c0_22 = arith.constant 0 : index
    %c0_23 = arith.constant 0 : index
    %40 = vector.load %arg7[%c0_22, %c0_23] : memref<8x128xf32, #tpu.memory_space<vmem>>, vector<8x128xf32>
    tpu.vector_store %arg7[%c0_22, %c0_23], %39 {strides = array<i32>} : memref<8x128xf32, #tpu.memory_space<vmem>>, vector<8x128xf32>,
    return
  }
  func.func @transform_0(%arg0: i32) -> (i32, i32) {
    %c0_i32 = arith.constant 0 : i32
    %c0_i32_0 = arith.constant 0 : i32
    return %arg0, %c0_i32 : i32, i32
  }
  func.func @transform_1(%arg0: i32) -> (i32, i32) {
    %c0_i32 = arith.constant 0 : i32
    %c0_i32_0 = arith.constant 0 : i32
    %c0_i32_1 = arith.constant 0 : i32
    return %c0_i32, %c0_i32_0 : i32, i32
  }
  func.func @transform_2(%arg0: i32) -> (i32, i32) {
    %c0_i32 = arith.constant 0 : i32
    %c0_i32_0 = arith.constant 0 : i32
    %c0_i32_1 = arith.constant 0 : i32
    return %c0_i32, %c0_i32_0 : i32, i32
  }
  func.func @transform_3(%arg0: i32) -> (i32, i32) {
    %c0_i32 = arith.constant 0 : i32
    %c0_i32_0 = arith.constant 0 : i32
    %c0_i32_1 = arith.constant 0 : i32
    return %c0_i32, %c0_i32_0 : i32, i32
  }
  func.func @transform_4(%arg0: i32) -> (i32, i32) {
    %c0_i32 = arith.constant 0 : i32
    %c0_i32_0 = arith.constant 0 : i32
    %c0_i32_1 = arith.constant 0 : i32
    return %c0_i32, %c0_i32_0 : i32, i32
  }
  func.func @transform_5(%arg0: i32) -> (i32, i32) {
    %c0_i32 = arith.constant 0 : i32
    %c0_i32_0 = arith.constant 0 : i32
    %c0_i32_1 = arith.constant 0 : i32
    return %c0_i32, %c0_i32_0 : i32, i32
  }
  func.func @transform_6(%arg0: i32) -> (i32, i32) {
    %c0_i32 = arith.constant 0 : i32
    %c0_i32_0 = arith.constant 0 : i32
    return %arg0, %c0_i32 : i32, i32
  }
}

module attributes {stable_mosaic.version = 11 : i64} {
  func.func @fc_kernel(%arg0: i32, %arg1: memref<8x896xbf16, #tpu.memory_space<vmem>>, %arg2: memref<896x256xbf16, #tpu.memory_space<vmem>>, %arg3: memref<256x128xbf16, #tpu.memory_space<vmem>>, %arg4: memref<128x32xbf16, #tpu.memory_space<vmem>>, %arg5: memref<32x128xbf16, #tpu.memory_space<vmem>>, %arg6: memref<4x256xf32, #tpu.memory_space<vmem>>, %arg7: memref<8x128xf32, #tpu.memory_space<vmem>>) attributes {dimension_semantics = [#tpu.dimension_semantics<parallel>], iteration_bounds = array<i64: 1>, scalar_prefetch = 0 : i64, scratch_operands = 0 : i64, tpu.core_type = #tpu.core_type<tc>, window_params = [{transform_indices = @transform_0, window_bounds = array<i64: 8, 896>}, {pipeline_mode = #tpu.pipeline_mode<synchronous>, transform_indices = @transform_1, window_bounds = array<i64: 896, 256>}, {pipeline_mode = #tpu.pipeline_mode<synchronous>, transform_indices = @transform_2, window_bounds = array<i64: 256, 128>}, {pipeline_mode = #tpu.pipeline_mode<synchronous>, transform_indices = @transform_3, window_bounds = array<i64: 128, 32>}, {pipeline_mode = #tpu.pipeline_mode<synchronous>, transform_indices = @transform_4, window_bounds = array<i64: 32, 128>}, {pipeline_mode = #tpu.pipeline_mode<synchronous>, transform_indices = @transform_5, window_bounds = array<i64: 4, 256>}, {transform_indices = @transform_6, window_bounds = array<i64: 8, 128>}]} {
    %c0 = arith.constant 0 : index
    %c0_0 = arith.constant 0 : index
    %0 = vector.load %arg6[%c0, %c0_0] : memref<4x256xf32, #tpu.memory_space<vmem>>, vector<1x256xf32>
    %c1 = arith.constant 1 : index
    %c0_1 = arith.constant 0 : index
    %1 = vector.load %arg6[%c1, %c0_1] : memref<4x256xf32, #tpu.memory_space<vmem>>, vector<1x128xf32>
    %c2 = arith.constant 2 : index
    %c0_2 = arith.constant 0 : index
    %2 = vector.load %arg6[%c2, %c0_2] : memref<4x256xf32, #tpu.memory_space<vmem>>, vector<1x32xf32>
    %c3 = arith.constant 3 : index
    %c0_3 = arith.constant 0 : index
    %3 = vector.load %arg6[%c3, %c0_3] : memref<4x256xf32, #tpu.memory_space<vmem>>, vector<1x128xf32>
    %c0_4 = arith.constant 0 : index
    %c0_5 = arith.constant 0 : index
    %4 = vector.load %arg1[%c0_4, %c0_5] : memref<8x896xbf16, #tpu.memory_space<vmem>>, vector<8x896xbf16>
    %c0_6 = arith.constant 0 : index
    %c0_7 = arith.constant 0 : index
    %5 = vector.load %arg2[%c0_6, %c0_7] : memref<896x256xbf16, #tpu.memory_space<vmem>>, vector<896x256xbf16>
    %cst = arith.constant dense<0.000000e+00> : vector<8x256xf32>
    %6 = tpu.matmul %4, %5, %cst {dimension_numbers = #tpu.dot_dimension_numbers<[1], [0], [0], [1], [0, 0, 1, 1], [], []>} : vector<8x896xbf16>, vector<896x256xbf16>, vector<8x256xf32> -> vector<8x256xf32>
    %7 = vector.broadcast %0 : vector<1x256xf32> to vector<8x256xf32>
    %8 = arith.addf %6, %7 : vector<8x256xf32>
    %cst_8 = arith.constant 0.000000e+00 : f32
    %9 = vector.broadcast %cst_8 : f32 to vector<8x256xf32>
    %10 = arith.maximumf %8, %9 : vector<8x256xf32>
    %11 = arith.truncf %10 : vector<8x256xf32> to vector<8x256xbf16>
    %c0_9 = arith.constant 0 : index
    %c0_10 = arith.constant 0 : index
    %12 = vector.load %arg3[%c0_9, %c0_10] : memref<256x128xbf16, #tpu.memory_space<vmem>>, vector<256x128xbf16>
    %cst_11 = arith.constant dense<0.000000e+00> : vector<8x128xf32>
    %13 = tpu.matmul %11, %12, %cst_11 {dimension_numbers = #tpu.dot_dimension_numbers<[1], [0], [0], [1], [0, 0, 1, 1], [], []>} : vector<8x256xbf16>, vector<256x128xbf16>, vector<8x128xf32> -> vector<8x128xf32>
    %14 = vector.broadcast %1 : vector<1x128xf32> to vector<8x128xf32>
    %15 = arith.addf %13, %14 : vector<8x128xf32>
    %cst_12 = arith.constant 0.000000e+00 : f32
    %16 = vector.broadcast %cst_12 : f32 to vector<8x128xf32>
    %17 = arith.maximumf %15, %16 : vector<8x128xf32>
    %18 = arith.truncf %17 : vector<8x128xf32> to vector<8x128xbf16>
    %c0_13 = arith.constant 0 : index
    %c0_14 = arith.constant 0 : index
    %19 = vector.load %arg4[%c0_13, %c0_14] : memref<128x32xbf16, #tpu.memory_space<vmem>>, vector<128x32xbf16>
    %cst_15 = arith.constant dense<0.000000e+00> : vector<8x32xf32>
    %20 = tpu.matmul %18, %19, %cst_15 {dimension_numbers = #tpu.dot_dimension_numbers<[1], [0], [0], [1], [0, 0, 1, 1], [], []>} : vector<8x128xbf16>, vector<128x32xbf16>, vector<8x32xf32> -> vector<8x32xf32>
    %21 = vector.broadcast %2 : vector<1x32xf32> to vector<8x32xf32>
    %22 = arith.addf %20, %21 : vector<8x32xf32>
    %cst_16 = arith.constant 0.000000e+00 : f32
    %23 = vector.broadcast %cst_16 : f32 to vector<8x32xf32>
    %24 = arith.maximumf %22, %23 : vector<8x32xf32>
    %25 = arith.truncf %24 : vector<8x32xf32> to vector<8x32xbf16>
    %c0_17 = arith.constant 0 : index
    %c0_18 = arith.constant 0 : index
    %26 = vector.load %arg5[%c0_17, %c0_18] : memref<32x128xbf16, #tpu.memory_space<vmem>>, vector<32x128xbf16>
    %cst_19 = arith.constant dense<0.000000e+00> : vector<8x128xf32>
    %27 = tpu.matmul %25, %26, %cst_19 {dimension_numbers = #tpu.dot_dimension_numbers<[1], [0], [0], [1], [0, 0, 1, 1], [], []>} : vector<8x32xbf16>, vector<32x128xbf16>, vector<8x128xf32> -> vector<8x128xf32>
    %28 = vector.broadcast %3 : vector<1x128xf32> to vector<8x128xf32>
    %29 = arith.addf %27, %28 : vector<8x128xf32>
    %cst_20 = arith.constant dense<0xFF800000> : vector<8xf32>
    %30 = vector.multi_reduction <maximumf>, %29, %cst_20 [1] : vector<8x128xf32> to vector<8xf32>
    %31 = vector.shape_cast %30 : vector<8xf32> to vector<8x1xf32>
    %32 = vector.broadcast %31 : vector<8x1xf32> to vector<8x128xf32>
    %33 = arith.subf %29, %32 : vector<8x128xf32>
    %34 = math.exp %33 : vector<8x128xf32>
    %cst_21 = arith.constant dense<0.000000e+00> : vector<8xf32>
    %35 = vector.multi_reduction <add>, %34, %cst_21 [1] : vector<8x128xf32> to vector<8xf32>
    %36 = vector.shape_cast %35 : vector<8xf32> to vector<8x1xf32>
    %37 = tpu.reciprocal %36 {approx = true} : vector<8x1xf32> -> vector<8x1xf32>
    %38 = vector.broadcast %37 : vector<8x1xf32> to vector<8x128xf32>
    %39 = arith.mulf %34, %38 : vector<8x128xf32>
    %c0_22 = arith.constant 0 : index
    %c0_23 = arith.constant 0 : index
    %40 = vector.load %arg7[%c0_22, %c0_23] : memref<8x128xf32, #tpu.memory_space<vmem>>, vector<8x128xf32>
    tpu.vector_store %arg7[%c0_22, %c0_23], %39 {strides = array<i32>} : memref<8x128xf32, #tpu.memory_space<vmem>>, vector<8x128xf32>,
    return
  }
  func.func @transform_0(%arg0: i32) -> (i32, i32) {
    %c0_i32 = arith.constant 0 : i32
    %c0_i32_0 = arith.constant 0 : i32
    return %arg0, %c0_i32 : i32, i32
  }
  func.func @transform_1(%arg0: i32) -> (i32, i32) {
    %c0_i32 = arith.constant 0 : i32
    %c0_i32_0 = arith.constant 0 : i32
    %c0_i32_1 = arith.constant 0 : i32
    return %c0_i32, %c0_i32_0 : i32, i32
  }
  func.func @transform_2(%arg0: i32) -> (i32, i32) {
    %c0_i32 = arith.constant 0 : i32
    %c0_i32_0 = arith.constant 0 : i32
    %c0_i32_1 = arith.constant 0 : i32
    return %c0_i32, %c0_i32_0 : i32, i32
  }
  func.func @transform_3(%arg0: i32) -> (i32, i32) {
    %c0_i32 = arith.constant 0 : i32
    %c0_i32_0 = arith.constant 0 : i32
    %c0_i32_1 = arith.constant 0 : i32
    return %c0_i32, %c0_i32_0 : i32, i32
  }
  func.func @transform_4(%arg0: i32) -> (i32, i32) {
    %c0_i32 = arith.constant 0 : i32
    %c0_i32_0 = arith.constant 0 : i32
    %c0_i32_1 = arith.constant 0 : i32
    return %c0_i32, %c0_i32_0 : i32, i32
  }
  func.func @transform_5(%arg0: i32) -> (i32, i32) {
    %c0_i32 = arith.constant 0 : i32
    %c0_i32_0 = arith.constant 0 : i32
    %c0_i32_1 = arith.constant 0 : i32
    return %c0_i32, %c0_i32_0 : i32, i32
  }
  func.func @transform_6(%arg0: i32) -> (i32, i32) {
    %c0_i32 = arith.constant 0 : i32
    %c0_i32_0 = arith.constant 0 : i32
    return %arg0, %c0_i32 : i32, i32
  }
}

</mosaic_0001>

<bundles_post_ra>
// kernel: tpu_custom_call.1
= control target key start
LH: loop header
LB: loop body
LE: loop exit
PB: predicated region body
PF: predicated region fallthrough
CT: control target
= control target key end

     0   :  { %11 = vsyncpa [#allocation3], 0  ;;  %s1980_s0 = inlined_call_operand.vmem [shape: bf16[8,896], index: 0, kind: input, shape index: {}]   ;;  %s1981_s1 = inlined_call_operand.hbm [shape: bf16[896,256], index: 1, kind: input, shape index: {}]   ;;  %s1982_s2 = inlined_call_operand.hbm [shape: bf16[256,128], index: 2, kind: input, shape index: {}]   ;;  %s1983_s3 = inlined_call_operand.vmem [shape: bf16[128,32], index: 3, kind: input, shape index: {}]   ;;  %s1984_s4 = inlined_call_operand.vmem [shape: bf16[32,128], index: 4, kind: input, shape index: {}]   ;;  %s1985_s5 = inlined_call_operand.vmem [shape: f32[4,256], index: 5, kind: input, shape index: {}]   ;;  %s1986_s6 = inlined_call_operand.hbm [shape: f32[8,128], index: 6, kind: output, shape index: {}]  }
   0x1   :  { %12 = vsyncpa [#allocation6], 0 }
   0x2   :  { %13 = vsyncpa [#allocation4], 0  ;;  %s1821_s21 = smov [#allocation2]   ;;  %s1749_s25 = scalar_lea.hbm %s1981_s1, 14336 }
   0x3   :  { %s21_s22 = sshll.u32 %s1821_s21, 4  ;;  %p1750_p0 = scmp.ne.s32.totalorder %s1981_s1, %s1749_s25  ;;  %s22_s22 = int_to_ptr.vmem [resolvable:$true] %s21_s22 }
   0x4   :  { %p1753_p1 = scmp.lt.u32.totalorder %s1749_s25, %s1981_s1 }
   0x6   :  { %p1755_p2 = pnand %p1753_p1, %p1750_p0 }
   0x8   :  { %1758 = shalt.err (!%p1755_p2)
}
   0x9   :  { %s1759_s30 = scalar_lea.vmem %s22_s22, 14336  ;;  %p1764_p4 = scmp.lt.s32.totalorder %s22_s22, %s22_s22 }
   0xa   :  { %p1760_p3 = scmp.ne.s32.totalorder %s22_s22, %s1759_s30  ;;  %p1765_p5 = scmp.lt.s32.totalorder %s1759_s30, %s1759_s30 }
   0xc   :  { %p1766_p6 = por %p1765_p5, %p1764_p4 }
   0xe   :  { %p1767_p7 = pnand %p1766_p6, %p1760_p3 }
  0x10   :  { %1770 = shalt.err (!%p1767_p7)
}
  0x11   :  { %s1822_s7 = smov 128   ;;  %s1823_s8 = smov 8  }
  0x12   :  { %27 = dma.hbm_to_vmem [thread:$0]  %s1981_s1, 14336, %s22_s22, [#allocation3], %s1822_s7, %s1822_s7, %s1823_s8  }
  0x13   :  { %s1824_s11 = smov [#allocation5]   ;;  %s1771_s15 = scalar_lea.hbm %s1982_s2, 2048 }
  0x14   :  { %s33_s12 = sshll.u32 %s1824_s11, 4  ;;  %p1772_p8 = scmp.ne.s32.totalorder %s1982_s2, %s1771_s15  ;;  %s34_s12 = int_to_ptr.vmem [resolvable:$true] %s33_s12 }
  0x15   :  { %p1775_p9 = scmp.lt.u32.totalorder %s1771_s15, %s1982_s2 }
  0x17   :  { %p1777_p10 = pnand %p1775_p9, %p1772_p8 }
  0x19   :  { %1780 = shalt.err (!%p1777_p10)
}
  0x1a   :  { %s1781_s20 = scalar_lea.vmem %s34_s12, 2048  ;;  %p1786_p12 = scmp.lt.s32.totalorder %s34_s12, %s34_s12 }
  0x1b   :  { %p1782_p11 = scmp.ne.s32.totalorder %s34_s12, %s1781_s20  ;;  %p1787_p13 = scmp.lt.s32.totalorder %s1781_s20, %s1781_s20 }
  0x1d   :  { %p1788_p0 = por %p1787_p13, %p1786_p12 }
  0x1f   :  { %p1789_p1 = pnand %p1788_p0, %p1782_p11 }
  0x21   :  { %1792 = shalt.err (!%p1789_p1)
}
  0x22   :  { %s1825_s1 = smov 64   ;;  %s1826_s21 = smov 4  }
  0x23   :  { %39 = dma.hbm_to_vmem [thread:$0]  %s1982_s2, 2048, %s34_s12, [#allocation6], %s1825_s1, %s1825_s1, %s1826_s21  }
  0x24   :  { %1815 = dma.done.wait [#allocation3], 14336  }
  0x25   :  { %1816 = vsyncadd [#allocation3], 4294952960 }
  0x26   :  { %1817 = dma.done.wait [#allocation6], 2048  }
  0x27   :  { %1818 = vsyncadd [#allocation6], 4294965248  ;;  %v1544_v0 = vld [vmem:[#allocation2 + $0x104] ss:$8 sps:$4 sm:$0xff]   ;;  %v1546_v1 = vld [vmem:[#allocation2 + $0x100] ss:$8 sps:$4 sm:$0xff]  }
  0x28   :  { %810 = vmatprep.subr.bf16.mxu0 %v1544_v0  ;;  %v1547_v2 = vld [vmem:[#allocation2 + $0x114] ss:$8 sps:$4 sm:$0xff]   ;;  %v1549_v3 = vld [vmem:[#allocation2 + $0x110] ss:$8 sps:$4 sm:$0xff]   ;;  %v1550_v4 = vld [vmem:[#allocation2 + $0x124] ss:$8 sps:$4 sm:$0xff]  }
  0x29   :  { %811 = vmatpush1.bf16.msra.mxu0 %v1546_v1  ;;  %v1552_v5 = vld [vmem:[#allocation2 + $0x120] ss:$8 sps:$4 sm:$0xff]   ;;  %v1553_v6 = vld [vmem:[#allocation2 + $0x134] ss:$8 sps:$4 sm:$0xff]   ;;  %v1555_v7 = vld [vmem:[#allocation2 + $0x130] ss:$8 sps:$4 sm:$0xff]  }
  0x2a   :  { %812 = vmatprep.subr.bf16.mxu0 %v1547_v2  ;;  %v1556_v8 = vld [vmem:[#allocation2 + $0x144] ss:$8 sps:$4 sm:$0xff]   ;;  %v1558_v9 = vld [vmem:[#allocation2 + $0x140] ss:$8 sps:$4 sm:$0xff]   ;;  %v1559_v10 = vld [vmem:[#allocation2 + $0x154] ss:$8 sps:$4 sm:$0xff]  }
  0x2b   :  { %v1561_v11 = vld [vmem:[#allocation2 + $0x150] ss:$8 sps:$4 sm:$0xff]   ;;  %v1562_v12 = vld [vmem:[#allocation2 + $0x164] ss:$8 sps:$4 sm:$0xff]   ;;  %v1564_v15 = vld [vmem:[#allocation2 + $0x160] ss:$8 sps:$4 sm:$0xff]  }
  0x2c   :  { %v1893_v13 = vld [vmem:[%s1980_s0 + $0x8] sm:$0xff]  ;;  %v1565_v16 = vld [vmem:[#allocation2 + $0x174] ss:$8 sps:$4 sm:$0xff]   ;;  %v1567_v17 = vld [vmem:[#allocation2 + $0x170] ss:$8 sps:$4 sm:$0xff]   ;;  %vm1829_vm0 = vmmov 0  }
  0x2d   :  { %813 = vmatpush1.bf16.msra.mxu0 %v1549_v3  ;;  %v1314_v14 = vcombine.high %v1893_v13, %v1893_v13  ;;  %v1568_v18 = vld [vmem:[#allocation2 + $0x184] ss:$8 sps:$4 sm:$0xff]   ;;  %v1570_v19 = vld [vmem:[#allocation2 + $0x180] ss:$8 sps:$4 sm:$0xff]   ;;  %v1571_v20 = vld [vmem:[#allocation2 + $0x194] ss:$8 sps:$4 sm:$0xff]   ;;  %v1313_v54 = vcombine.low %v1893_v13, %v1893_v13 }
  0x2e   :  { %814 = vmatprep.subr.bf16.mxu0 %v1550_v4  ;;  %v1615_v21 = vld [vmem:[#allocation2 + $0x4] ss:$8 sps:$4 sm:$0xff]   ;;  %v1617_v22 = vld [vmem:[#allocation2] ss:$8 sps:$4 sm:$0xff]   ;;  %v1621_v23 = vld [vmem:[#allocation2 + $0x14] ss:$8 sps:$4 sm:$0xff]  }
  0x2f   :  { %842 = vmatprep.mubr.bf16.mxu0 %v1314_v14  ;;  %769 = vmatprep.subr.bf16.mxu1 %v1615_v21  ;;  %v1623_v24 = vld [vmem:[#allocation2 + $0x10] ss:$8 sps:$4 sm:$0xff]   ;;  %v1574_v26 = vld [vmem:[#allocation2 + $0x1a4] ss:$8 sps:$4 sm:$0xff]   ;;  %v1576_v28 = vld [vmem:[#allocation2 + $0x1a0] ss:$8 sps:$4 sm:$0xff]  }
  0x30   :  { %770 = vmatpush1.bf16.msra.mxu1 %v1617_v22  ;;  %v1573_v25 = vld [vmem:[#allocation2 + $0x190] ss:$8 sps:$4 sm:$0xff]   ;;  %v1627_v27 = vld [vmem:[#allocation2 + $0x24] ss:$8 sps:$4 sm:$0xff]   ;;  %v1629_v29 = vld [vmem:[#allocation2 + $0x20] ss:$8 sps:$4 sm:$0xff]  }
  0x31   :  { %815 = vmatpush1.bf16.msra.mxu0 %v1552_v5  ;;  %771 = vmatprep.subr.bf16.mxu1 %v1621_v23  ;;  %v1633_v30 = vld [vmem:[#allocation2 + $0x34] ss:$8 sps:$4 sm:$0xff]   ;;  %v1579_v32 = vld [vmem:[#allocation2 + $0x1b0] ss:$8 sps:$4 sm:$0xff]   ;;  %v1639_v34 = vld [vmem:[#allocation2 + $0x44] ss:$8 sps:$4 sm:$0xff]  }
  0x32   :  { %816 = vmatprep.subr.bf16.mxu0 %v1553_v6  ;;  %v1577_v31 = vld [vmem:[#allocation2 + $0x1b4] ss:$8 sps:$4 sm:$0xff]   ;;  %v1635_v33 = vld [vmem:[#allocation2 + $0x30] ss:$8 sps:$4 sm:$0xff]   ;;  %v1580_v35 = vld [vmem:[#allocation2 + $0x1c4] ss:$8 sps:$4 sm:$0xff]  }
  0x33   :  { %v1582_v36 = vld [vmem:[#allocation2 + $0x1c0] ss:$8 sps:$4 sm:$0xff]   ;;  %v1645_v38 = vld [vmem:[#allocation2 + $0x54] ss:$8 sps:$4 sm:$0xff]   ;;  %v1585_v40 = vld [vmem:[#allocation2 + $0x1d0] ss:$8 sps:$4 sm:$0xff]  }
  0x34   :  { %772 = vmatpush1.bf16.msra.mxu1 %v1623_v24  ;;  %v1641_v37 = vld [vmem:[#allocation2 + $0x40] ss:$8 sps:$4 sm:$0xff]   ;;  %v1583_v39 = vld [vmem:[#allocation2 + $0x1d4] ss:$8 sps:$4 sm:$0xff]   ;;  %v1647_v41 = vld [vmem:[#allocation2 + $0x50] ss:$8 sps:$4 sm:$0xff]  }
  0x35   :  { %817 = vmatpush1.bf16.msra.mxu0 %v1555_v7  ;;  %773 = vmatprep.subr.bf16.mxu1 %v1627_v27  ;;  %v1651_v42 = vld [vmem:[#allocation2 + $0x64] ss:$8 sps:$4 sm:$0xff]   ;;  %v1588_v44 = vld [vmem:[#allocation2 + $0x1e0] ss:$8 sps:$4 sm:$0xff]   ;;  %v1657_v46 = vld [vmem:[#allocation2 + $0x74] ss:$8 sps:$4 sm:$0xff]  }
  0x36   :  { %818 = vmatprep.subr.bf16.mxu0 %v1556_v8  ;;  %v1586_v43 = vld [vmem:[#allocation2 + $0x1e4] ss:$8 sps:$4 sm:$0xff]   ;;  %v1653_v45 = vld [vmem:[#allocation2 + $0x60] ss:$8 sps:$4 sm:$0xff]   ;;  %v1589_v47 = vld [vmem:[#allocation2 + $0x1f4] ss:$8 sps:$4 sm:$0xff]  }
  0x37   :  { %v1591_v48 = vld [vmem:[#allocation2 + $0x1f0] ss:$8 sps:$4 sm:$0xff]   ;;  %v1663_v50 = vld [vmem:[#allocation2 + $0x84] ss:$8 sps:$4 sm:$0xff]   ;;  %v1594_v52 = vld [vmem:[#allocation2 + $0x200] ss:$8 sps:$4 sm:$0xff]  }
  0x38   :  { %774 = vmatpush1.bf16.msra.mxu1 %v1629_v29  ;;  %v1659_v49 = vld [vmem:[#allocation2 + $0x70] ss:$8 sps:$4 sm:$0xff]   ;;  %v1596_v51 = vld [vmem:[#allocation2 + $0x204] ss:$8 sps:$4 sm:$0xff]   ;;  %v1665_v55 = vld [vmem:[#allocation2 + $0x80] ss:$8 sps:$4 sm:$0xff]  }
  0x39   :  { %819 = vmatpush1.bf16.msra.mxu0 %v1558_v9  ;;  %775 = vmatprep.subr.bf16.mxu1 %v1633_v30  ;;  %v1900_v53 = vld [vmem:[%s1980_s0 + $0x10] sm:$0xff]  ;;  %v1677_v61 = vld [vmem:[#allocation2 + $0xa4] ss:$8 sps:$4 sm:$0xff]   ;;  %v1600_v63 = vld [vmem:[#allocation2 + $0x220] ss:$8 sps:$4 sm:$0xff]   ;;  %vm1241_vm1 = vcmask 261120  }
  0x3a   :  { %820 = vmatprep.subr.bf16.mxu0 %v1559_v10  ;;  %v1669_v56 = vld [vmem:[#allocation2 + $0x94] ss:$8 sps:$4 sm:$0xff]   ;;  %v1316_v58 = vcombine.high %v1900_v53, %v1900_v53  ;;  %v1597_v59 = vld [vmem:[#allocation2 + $0x210] ss:$8 sps:$4 sm:$0xff]   ;;  %v1602_v62 = vld [vmem:[#allocation2 + $0x224] ss:$8 sps:$4 sm:$0xff]  }
  0x3b   :  { %v1599_v57 = vld [vmem:[#allocation2 + $0x214] ss:$8 sps:$4 sm:$0xff]   ;;  %v1671_v60 = vld [vmem:[#allocation2 + $0x90] ss:$8 sps:$4 sm:$0xff]   ;;  %v1679_v0 = vld [vmem:[#allocation2 + $0xa0] ss:$8 sps:$4 sm:$0xff]  }
  0x3c   :  { %776 = vmatpush1.bf16.msra.mxu1 %v1635_v33  ;;  %v1683_v1 = vld [vmem:[#allocation2 + $0xb4] ss:$8 sps:$4 sm:$0xff]   ;;  %v1685_v3 = vld [vmem:[#allocation2 + $0xb0] ss:$8 sps:$4 sm:$0xff]   ;;  %v57_v4 = vld [vmem:[%s1980_s0] sm:$0xff] }
  0x3d   :  { %821 = vmatpush1.bf16.msra.mxu0 %v1561_v11  ;;  %777 = vmatprep.subr.bf16.mxu1 %v1639_v34  ;;  %v1605_v2 = vld [vmem:[#allocation2 + $0x234] ss:$8 sps:$4 sm:$0xff]   ;;  %v1603_v5 = vld [vmem:[#allocation2 + $0x230] ss:$8 sps:$4 sm:$0xff]   ;;  %v1689_v6 = vld [vmem:[#allocation2 + $0xc4] ss:$8 sps:$4 sm:$0xff]   ;;  %v1312_v7 = vcombine.high %v57_v4, %v57_v4  ;;  %v1311_v27 = vcombine.low %v57_v4, %v57_v4 }
  0x3e   :  { %822 = vmatprep.subr.bf16.mxu0 %v1562_v12  ;;  %v1608_v8 = vld [vmem:[#allocation2 + $0x244] ss:$8 sps:$4 sm:$0xff]   ;;  %v1606_v9 = vld [vmem:[#allocation2 + $0x240] ss:$8 sps:$4 sm:$0xff]   ;;  %v1695_v11 = vld [vmem:[#allocation2 + $0xd4] ss:$8 sps:$4 sm:$0xff]  }
  0x3f   :  { %801 = vmatprep.mubr.bf16.mxu1 %v1312_v7  ;;  %v1691_v10 = vld [vmem:[#allocation2 + $0xc0] ss:$8 sps:$4 sm:$0xff]   ;;  %v1611_v12 = vld [vmem:[#allocation2 + $0x254] ss:$8 sps:$4 sm:$0xff]   ;;  %v1609_v13 = vld [vmem:[#allocation2 + $0x250] ss:$8 sps:$4 sm:$0xff]  }
  0x40   :  { %778 = vmatpush1.bf16.msra.mxu1 %v1641_v37  ;;  %v1697_v14 = vld [vmem:[#allocation2 + $0xd0] ss:$8 sps:$4 sm:$0xff]   ;;  %v1719_v23 = vld [vmem:[#allocation5 + $0x40] sm:$0xff]   ;;  %v1632_v29 = vld [vmem:[#allocation2 + $0x294] ss:$8 sps:$4 sm:$0xff]  }
  0x41   :  { %823 = vmatpush1.bf16.msra.mxu0 %v1564_v15  ;;  %779 = vmatprep.subr.bf16.mxu1 %v1645_v38  ;;  %v1701_v15 = vld [vmem:[#allocation2 + $0xe4] ss:$8 sps:$4 sm:$0xff]   ;;  %v1709_v21 = vld [vmem:[#allocation2 + $0xf0] ss:$8 sps:$4 sm:$0xff]   ;;  %v1644_v37 = vld [vmem:[#allocation2 + $0x2b4] ss:$8 sps:$4 sm:$0xff]  }
  0x42   :  { %824 = vmatprep.subr.bf16.mxu0 %v1565_v16  ;;  %v1614_v16 = vld [vmem:[#allocation2 + $0x264] ss:$8 sps:$4 sm:$0xff]   ;;  %v1618_v22 = vld [vmem:[#allocation2 + $0x270] ss:$8 sps:$4 sm:$0xff]  }
  0x43   :  { %v1626_v24 = vld [vmem:[#allocation2 + $0x284] ss:$8 sps:$4 sm:$0xff]   ;;  %v1724_v34 = vld [vmem:[#allocation5 + $0x10] sm:$0xff]   ;;  %v1726_v38 = vld [vmem:[#allocation5 + $0x18] sm:$0xff]  }
  0x44   :  { %780 = vmatpush1.bf16.msra.mxu1 %v1647_v41  ;;  %v1722_v30 = vld [vmem:[#allocation5 + $0x8] sm:$0xff]   ;;  %v1718_v4 = vld [vmem:[%s1980_s0 + $0x18] ss:$0 sps:$4 sm:$0xff]   ;;  %v1731_v7 = vld [vmem:[#allocation5 + $0x70] sm:$0xff]  }
  0x45   :  { %825 = vmatpush1.bf16.msra.mxu0 %v1567_v17  ;;  %781 = vmatprep.subr.bf16.mxu1 %v1651_v42  ;;  %v1612_v17 = vld [vmem:[#allocation2 + $0x260] ss:$8 sps:$4 sm:$0xff]   ;;  %v1638_v33 = vld [vmem:[#allocation2 + $0x2a4] ss:$8 sps:$4 sm:$0xff]  }
  0x46   :  { %826 = vmatprep.subr.bf16.mxu0 %v1568_v18  ;;  %v1620_v18 = vld [vmem:[#allocation2 + $0x274] ss:$8 sps:$4 sm:$0xff]   ;;  %v1650_v41 = vld [vmem:[#allocation2 + $0x2c4] ss:$8 sps:$4 sm:$0xff]  }
  0x47   :  { %v1728_v42 = vld [vmem:[#allocation5 + $0x20] sm:$0xff]  }
  0x48   :  { %782 = vmatpush1.bf16.msra.mxu1 %v1653_v45  ;;  %v1654_v45 = vld [vmem:[#allocation2 + $0x2d0] ss:$8 sps:$4 sm:$0xff]  }
  0x49   :  { %827 = vmatpush1.bf16.msra.mxu0 %v1570_v19  ;;  %783 = vmatprep.subr.bf16.mxu1 %v1657_v46  ;;  %v1703_v19 = vld [vmem:[#allocation2 + $0xe0] ss:$8 sps:$4 sm:$0xff]   ;;  %v1662_v46 = vld [vmem:[#allocation2 + $0x2e4] ss:$8 sps:$4 sm:$0xff]  }
  0x4a   :  { %828 = vmatprep.subr.bf16.mxu0 %v1571_v20  ;;  %v1707_v20 = vld [vmem:[#allocation2 + $0xf4] ss:$8 sps:$4 sm:$0xff]  }
  0x4c   :  { %784 = vmatpush1.bf16.msra.mxu1 %v1659_v49  ;;  %v1666_v49 = vld [vmem:[#allocation2 + $0x2f0] ss:$8 sps:$4 sm:$0xff]  }
  0x4d   :  { %829 = vmatpush1.bf16.msra.mxu0 %v1573_v25  ;;  %785 = vmatprep.subr.bf16.mxu1 %v1663_v50  ;;  %v1720_v25 = vld [vmem:[#allocation5] sm:$0xff]  }
  0x4e   :  { %830 = vmatprep.subr.bf16.mxu0 %v1574_v26  ;;  %v1624_v26 = vld [vmem:[#allocation2 + $0x280] ss:$8 sps:$4 sm:$0xff]   ;;  %v1676_v50 = vld [vmem:[#allocation2 + $0x304] ss:$8 sps:$4 sm:$0xff]  }
  0x50   :  { %786 = vmatpush1.bf16.msra.mxu1 %v1665_v55  ;;  %v1680_v55 = vld [vmem:[#allocation2 + $0x310] ss:$8 sps:$4 sm:$0xff]  }
  0x51   :  { %831 = vmatpush1.bf16.msra.mxu0 %v1576_v28  ;;  %787 = vmatprep.subr.bf16.mxu1 %v1669_v56  ;;  %v1721_v28 = vld [vmem:[#allocation5 + $0x48] sm:$0xff]   ;;  %v1827_v56 = vmov 0  }
  0x52   :  { %832 = vmatprep.subr.bf16.mxu0 %v1577_v31  ;;  %v1630_v31 = vld [vmem:[#allocation2 + $0x290] ss:$8 sps:$4 sm:$0xff]  }
  0x54   :  { %788 = vmatpush1.bf16.msra.mxu1 %v1671_v60  ;;  %v1692_v60 = vld [vmem:[#allocation2 + $0x330] ss:$8 sps:$4 sm:$0xff]  }
  0x55   :  { %833 = vmatpush1.bf16.msra.mxu0 %v1579_v32  ;;  %789 = vmatprep.subr.bf16.mxu1 %v1677_v61  ;;  %v1723_v32 = vld [vmem:[#allocation5 + $0x50] sm:$0xff]   ;;  %v1700_v61 = vld [vmem:[#allocation2 + $0x344] ss:$8 sps:$4 sm:$0xff]  }
  0x56   :  { %834 = vmatprep.subr.bf16.mxu0 %v1580_v35  ;;  %v1636_v35 = vld [vmem:[#allocation2 + $0x2a0] ss:$8 sps:$4 sm:$0xff]  }
  0x58   :  { %790 = vmatpush1.bf16.msra.mxu1 %v1679_v0  ;;  %v1712_v0 = vld [vmem:[#allocation2 + $0x364] ss:$8 sps:$4 sm:$0xff]  }
  0x59   :  { %835 = vmatpush1.bf16.msra.mxu0 %v1582_v36  ;;  %791 = vmatprep.subr.bf16.mxu1 %v1683_v1  ;;  %v1725_v36 = vld [vmem:[#allocation5 + $0x58] sm:$0xff]   ;;  %v1710_v1 = vld [vmem:[#allocation2 + $0x360] ss:$8 sps:$4 sm:$0xff]  }
  0x5a   :  { %836 = vmatprep.subr.bf16.mxu0 %v1583_v39  ;;  %v1642_v39 = vld [vmem:[#allocation2 + $0x2b0] ss:$8 sps:$4 sm:$0xff]  }
  0x5c   :  { %792 = vmatpush1.bf16.msra.mxu1 %v1685_v3  ;;  %v1715_v3 = vld [vmem:[#allocation2 + $0x370] ss:$8 sps:$4 sm:$0xff]  }
  0x5d   :  { %837 = vmatpush1.bf16.msra.mxu0 %v1585_v40  ;;  %793 = vmatprep.subr.bf16.mxu1 %v1689_v6  ;;  %v1727_v40 = vld [vmem:[#allocation5 + $0x60] sm:$0xff]   ;;  %v1730_v6 = vld [vmem:[#allocation5 + $0x28] sm:$0xff]  }
  0x5e   :  { %838 = vmatprep.subr.bf16.mxu0 %v1586_v43  ;;  %v1648_v43 = vld [vmem:[#allocation2 + $0x2c0] ss:$8 sps:$4 sm:$0xff]  }
  0x60   :  { %794 = vmatpush1.bf16.msra.mxu1 %v1691_v10  ;;  %v1734_v10 = vld [vmem:[#allocation5 + $0x38] sm:$0xff]  }
  0x61   :  { %839 = vmatpush1.bf16.msra.mxu0 %v1588_v44  ;;  %795 = vmatprep.subr.bf16.mxu1 %v1695_v11  ;;  %v1656_v44 = vld [vmem:[#allocation2 + $0x2d4] ss:$8 sps:$4 sm:$0xff]   ;;  %v1828_v11 = vmov 0.0  }
  0x62   :  { %840 = vmatprep.subr.bf16.mxu0 %v1589_v47  ;;  %v1660_v47 = vld [vmem:[#allocation2 + $0x2e0] ss:$8 sps:$4 sm:$0xff]  }
  0x64   :  { %796 = vmatpush1.bf16.msra.mxu1 %v1697_v14 }
  0x65   :  { %841 = vmatpush1.bf16.msra.mxu0 %v1591_v48  ;;  %797 = vmatprep.subr.bf16.mxu1 %v1701_v15  ;;  %v1668_v48 = vld [vmem:[#allocation2 + $0x2f4] ss:$8 sps:$4 sm:$0xff]  }
  0x66   :  { %851 = vmatprep.subr.bf16.mxu0 %v1596_v51  ;;  %v1315_v51 = vcombine.low %v1900_v53, %v1900_v53  ;;  %v1698_v53 = vld [vmem:[#allocation2 + $0x340] ss:$8 sps:$4 sm:$0xff]  }
  0x68   :  { %843 = vmatmul.mubr.bf16.vlgmr.msra.gmra.mrb[0].mxu0 %v1313_v54  ;;  %798 = vmatpush1.bf16.msra.mxu1 %v1703_v19  ;;  %v1682_v54 = vld [vmem:[#allocation2 + $0x314] ss:$8 sps:$4 sm:$0xff]   ;;  %v53_v19 = vld [vmem:[%s1985_s5] ss:$4 sm:$0x3] }
  0x69   :  { %852 = vmatpush1.bf16.msra.mxu0 %v1594_v52  ;;  %883 = vmatprep.mubr.bf16.mxu0 %v1316_v58  ;;  %v1674_v52 = vld [vmem:[#allocation2 + $0x300] ss:$8 sps:$4 sm:$0xff]  }
  0x6a   :  { %853 = vmatprep.subr.bf16.mxu0 %v1599_v57  ;;  %799 = vmatprep.subr.bf16.mxu1 %v1707_v20  ;;  %v1688_v57 = vld [vmem:[#allocation2 + $0x324] ss:$8 sps:$4 sm:$0xff]   ;;  %v1686_v58 = vld [vmem:[#allocation2 + $0x320] ss:$8 sps:$4 sm:$0xff]  }
  0x6c   :  { %800 = vmatpush1.bf16.msra.mxu1 %v1709_v21 }
  0x6d   :  { %854 = vmatpush1.bf16.msra.mxu0 %v1597_v59  ;;  %1460 = vmatprep.subr.bf16.mxu1 %v1719_v23  ;;  %v1694_v59 = vld [vmem:[#allocation2 + $0x334] ss:$8 sps:$4 sm:$0xff]  }
  0x6e   :  { %855 = vmatprep.subr.bf16.mxu0 %v1602_v62  ;;  %v1706_v62 = vld [vmem:[#allocation2 + $0x354] ss:$8 sps:$4 sm:$0xff]  }
  0x6f   :  { %802 = vmatmul.mubr.bf16.vlgmr.msra.gmra.mrb[0].mxu1 %v1311_v27 }
  0x70   :  { %1461 = vmatpush3.bf16.msra.mxu1 %v1720_v25 }
  0x71   :  { %856 = vmatpush1.bf16.msra.mxu0 %v1600_v63  ;;  %1462 = vmatprep.subr.bf16.mxu1 %v1721_v28  ;;  %v1704_v63 = vld [vmem:[#allocation2 + $0x350] ss:$8 sps:$4 sm:$0xff]  }
  0x72   :  { %857 = vmatprep.subr.bf16.mxu0 %v1605_v2  ;;  %v1717_v2 = vld [vmem:[#allocation2 + $0x374] ss:$8 sps:$4 sm:$0xff]  }
  0x74   :  { %1463 = vmatpush3.bf16.msra.mxu1 %v1722_v30 }
  0x75   :  { %858 = vmatpush1.bf16.msra.mxu0 %v1603_v5  ;;  %1464 = vmatprep.subr.bf16.mxu1 %v1723_v32  ;;  %v1729_v5 = vld [vmem:[#allocation5 + $0x68] sm:$0xff]  }
  0x76   :  { %859 = vmatprep.subr.bf16.mxu0 %v1608_v8  ;;  %v1732_v8 = vld [vmem:[#allocation5 + $0x30] sm:$0xff]  }
  0x78   :  { %1465 = vmatpush3.bf16.msra.mxu1 %v1724_v34  ;;  %v1735_v34 = vld [vmem:[%s1983_s3] sm:$0xff]  }
  0x79   :  { %860 = vmatpush1.bf16.msra.mxu0 %v1606_v9  ;;  %1466 = vmatprep.subr.bf16.mxu1 %v1725_v36  ;;  %v1733_v9 = vld [vmem:[#allocation5 + $0x78] sm:$0xff]   ;;  %v1736_v36 = vld [vmem:[%s1983_s3 + $0x8] sm:$0xff]  }
  0x7a   :  { %861 = vmatprep.subr.bf16.mxu0 %v1611_v12 }
  0x7c   :  { %1467 = vmatpush3.bf16.msra.mxu1 %v1726_v38  ;;  %v1738_v38 = vld [vmem:[%s1983_s3 + $0x18] sm:$0xff]  }
  0x7d   :  { %862 = vmatpush1.bf16.msra.mxu0 %v1609_v13  ;;  %1468 = vmatprep.subr.bf16.mxu1 %v1727_v40  ;;  %v1740_v40 = vld [vmem:[%s1983_s3 + $0x28] sm:$0xff]  }
  0x7e   :  { %863 = vmatprep.subr.bf16.mxu0 %v1614_v16  ;;  %v174_v16 = vlaneseq }
  0x80   :  { %1469 = vmatpush3.bf16.msra.mxu1 %v1728_v42  ;;  %v1742_v42 = vld [vmem:[%s1983_s3 + $0x38] sm:$0xff]  }
  0x81   :  { %864 = vmatpush1.bf16.msra.mxu0 %v1612_v17  ;;  %1470 = vmatprep.subr.bf16.mxu1 %v1729_v5  ;;  %v175_v17 = vshrl.u32 %v174_v16, 7 }
  0x82   :  { %865 = vmatprep.subr.bf16.mxu0 %v1620_v18 }
  0x83   :  { %v176_v18 = vsub.s32 0, %v175_v17  ;;  %v180_v20 = vsub.s32 1, %v175_v17 }
  0x84   :  { %1471 = vmatpush3.bf16.msra.mxu1 %v1730_v6 }
  0x85   :  { %866 = vmatpush1.bf16.msra.mxu0 %v1618_v22  ;;  %1472 = vmatprep.subr.bf16.mxu1 %v1731_v7  ;;  %v177_v21 = vrot.slane %v53_v19, %v176_v18  ;;  %v181_v22 = vrot.slane %v53_v19, %v180_v20 }
  0x86   :  { %867 = vmatprep.subr.bf16.mxu0 %v1626_v24 }
  0x88   :  { %1473 = vmatpush3.bf16.msra.mxu1 %v1732_v8 }
  0x89   :  { %868 = vmatpush1.bf16.msra.mxu0 %v1624_v26  ;;  %1474 = vmatprep.subr.bf16.mxu1 %v1733_v9 }
  0x8a   :  { %869 = vmatprep.subr.bf16.mxu0 %v1632_v29 }
  0x8c   :  { %1475 = vmatpush3.bf16.msra.mxu1 %v1734_v10 }
  0x8d   :  { %870 = vmatpush1.bf16.msra.mxu0 %v1630_v31  ;;  %1494 = vmatprep.subr.bf16.mxu1 %v1828_v11 }
  0x8e   :  { %871 = vmatprep.subr.bf16.mxu0 %v1638_v33 }
  0x91   :  { %872 = vmatpush1.bf16.msra.mxu0 %v1636_v35 }
  0x92   :  { %873 = vmatprep.subr.bf16.mxu0 %v1644_v37  ;;  %v1737_v37 = vld [vmem:[%s1983_s3 + $0x10] sm:$0xff]  }
  0x95   :  { %874 = vmatpush1.bf16.msra.mxu0 %v1642_v39  ;;  %v1739_v39 = vld [vmem:[%s1983_s3 + $0x20] sm:$0xff]  }
  0x96   :  { %875 = vmatprep.subr.bf16.mxu0 %v1650_v41  ;;  %v1741_v41 = vld [vmem:[%s1983_s3 + $0x30] sm:$0xff]  }
  0x99   :  { %876 = vmatpush1.bf16.msra.mxu0 %v1648_v43 }
  0x9a   :  { %877 = vmatprep.subr.bf16.mxu0 %v1656_v44  ;;  %v1430_v44 = vld [vmem:[%s1985_s5 + $0x1] ss:$0 sm:$0xff] }
  0x9d   :  { %878 = vmatpush1.bf16.msra.mxu0 %v1654_v45 }
  0x9e   :  { %879 = vmatprep.subr.bf16.mxu0 %v1662_v46 }
  0xa1   :  { %880 = vmatpush1.bf16.msra.mxu0 %v1660_v47 }
  0xa2   :  { %881 = vmatprep.subr.bf16.mxu0 %v1668_v48 }
  0xa5   :  { %882 = vmatpush1.bf16.msra.mxu0 %v1666_v49 }
  0xa6   :  { %892 = vmatprep.subr.bf16.mxu0 %v1676_v50 }
  0xa8   :  { %884 = vmatmul.mubr.bf16.vlgmr.msra.gmra.mrb[0].mxu0 %v1315_v51  ;;  %v1743_v51 = vld [vmem:[%s1984_s4] sm:$0xff]  }
  0xa9   :  { %893 = vmatpush1.bf16.msra.mxu0 %v1674_v52  ;;  %924 = vmatprep.mubr.bf16.mxu0 %v1827_v56 }
  0xaa   :  { %894 = vmatprep.subr.bf16.mxu0 %v1682_v54  ;;  %v1744_v54 = vld [vmem:[%s1984_s4 + $0x8] sm:$0xff]   ;;  %s1830_s4 = smov [#allocation7]  }
  0xab   :  { %s1301_s0 = sshll.u32 %s1830_s4, 4  ;;  %s1302_s0 = int_to_ptr.vmem [resolvable:$true] %s1301_s0 }
  0xac   :  { %p1798_p3 = scmp.lt.s32.totalorder %s1302_s0, %s1302_s0 }
  0xad   :  { %895 = vmatpush1.bf16.msra.mxu0 %v1680_v55  ;;  %v1447_v55 = vld [vmem:[%s1985_s5 + $0x2] ss:$0 sm:$0xff] }
  0xae   :  { %896 = vmatprep.subr.bf16.mxu0 %v1688_v57 }
  0xb1   :  { %897 = vmatpush1.bf16.msra.mxu0 %v1686_v58 }
  0xb2   :  { %898 = vmatprep.subr.bf16.mxu0 %v1694_v59 }
  0xb5   :  { %899 = vmatpush1.bf16.msra.mxu0 %v1692_v60 }
  0xb6   :  { %900 = vmatprep.subr.bf16.mxu0 %v1700_v61 }
  0xb9   :  { %901 = vmatpush1.bf16.msra.mxu0 %v1698_v53 }
  0xba   :  { %902 = vmatprep.subr.bf16.mxu0 %v1706_v62  ;;  %v1456_v62 = vld [vmem:[%s1985_s5 + $0x3] ss:$0 sm:$0xff]  ;;  %s1793_s5 = scalar_lea.vmem %s1302_s0, 128 }
  0xbb   :  { %p1794_p2 = scmp.ne.s32.totalorder %s1302_s0, %s1793_s5  ;;  %p1799_p4 = scmp.lt.s32.totalorder %s1793_s5, %s1793_s5 }
  0xbd   :  { %903 = vmatpush1.bf16.msra.mxu0 %v1704_v63  ;;  %p1800_p5 = por %p1799_p4, %p1798_p3 }
  0xbe   :  { %904 = vmatprep.subr.bf16.mxu0 %v1712_v0 }
  0xbf   :  { %p1801_p6 = pnand %p1800_p5, %p1794_p2 }
  0xc1   :  { %905 = vmatpush1.bf16.msra.mxu0 %v1710_v1 }
  0xc2   :  { %906 = vmatprep.subr.bf16.mxu0 %v1717_v2 }
  0xc5   :  { %907 = vmatpush1.bf16.msra.mxu0 %v1715_v3 }
  0xc8   :  { %925 = vmatmul.mubr.bf16.vlgmr.msra.gmra.mrb[0].mxu0 %v1718_v4 }
 0x142   :  { %v803_v12 = vpop.f32.mrb[0].mxu1 }
 0x143   :  { %v805_v13 = vpop.f32.mrb[1].mxu1  ;;  %v804_v23 = vadd.f32 %v803_v12, %v177_v21 }
 0x144   :  { %v807_v14 = vpop.f32.mrb[2].mxu1  ;;  %v806_v24 = vadd.f32 %v805_v13, %v181_v22 }
 0x145   :  { %v808_v15 = vpop.f32.mrb[3].mxu1 }
 0x19b   :  { %v926_v25 = vpop.f32.mrb[0].mxu0 }
 0x19c   :  { %v1523_v26 = vadd.f32 %v926_v25, %v804_v23  ;;  %v928_v27 = vpop.f32.mrb[1].mxu0 }
 0x19d   :  { %v1525_v28 = vadd.f32 %v928_v27, %v806_v24  ;;  %v930_v29 = vpop.f32.mrb[2].mxu0 }
 0x19e   :  { %v933_v30 = vmax.f32 %v1523_v26, 0.0  ;;  %v931_v31 = vpop.f32.mrb[3].mxu0 }
 0x19f   :  { %v934_v32 = vmax.f32 %v1525_v28, 0.0 }
 0x1a0   :  { %v935_v35 = vpack.c.bf16 %v933_v30, %v933_v30 }
 0x1a1   :  { %v936_v33 = vpack.c.bf16 %v934_v32, %v934_v32 }
 0x1a3   :  { %1101 = vmatprep.mubr.bf16.mxu1 %v936_v33 }
 0x1a4   :  { %1102 = vmatmul.mubr.bf16.vlgmr.msra.gmra.mrb[4].mxu1 %v935_v35 }
 0x1a5   :  { %1495 = vmatpush3.bf16.msra.mxu1 %v1735_v34  ;;  %1510 = vmatprep.mubr.msk.bf16.mxu1 %vm1829_vm0, %v1828_v11 }
 0x1a6   :  { %1496 = vmatprep.subr.bf16.mxu1 %v1828_v11 }
 0x1a9   :  { %1497 = vmatpush3.bf16.msra.mxu1 %v1736_v36 }
 0x1aa   :  { %1498 = vmatprep.subr.bf16.mxu1 %v1828_v11 }
 0x1ad   :  { %1499 = vmatpush3.bf16.msra.mxu1 %v1737_v37 }
 0x1ae   :  { %1500 = vmatprep.subr.bf16.mxu1 %v1828_v11 }
 0x1b1   :  { %1501 = vmatpush3.bf16.msra.mxu1 %v1738_v38 }
 0x1b2   :  { %1502 = vmatprep.subr.bf16.mxu1 %v1828_v11 }
 0x1b5   :  { %1503 = vmatpush3.bf16.msra.mxu1 %v1739_v39 }
 0x1b6   :  { %1504 = vmatprep.subr.bf16.mxu1 %v1828_v11 }
 0x1b9   :  { %1505 = vmatpush3.bf16.msra.mxu1 %v1740_v40 }
 0x1ba   :  { %1506 = vmatprep.subr.bf16.mxu1 %v1828_v11 }
 0x1bd   :  { %1507 = vmatpush3.bf16.msra.mxu1 %v1741_v41 }
 0x1be   :  { %1508 = vmatprep.subr.bf16.mxu1 %v1828_v11 }
 0x1c1   :  { %1509 = vmatpush3.bf16.msra.mxu1 %v1742_v42 }
 0x1c2   :  { %1514 = vmatprep.subr.bf16.mxu1 %v1828_v11 }
 0x277   :  { %v1476_v43 = vpop.f32.mrb[4].mxu1 }
 0x278   :  { %v1477_v45 = vpop.f32.mrb[5].mxu1 }
 0x279   :  { %v1478_v46 = vadd.f32 %v1477_v45, %v1476_v43  ;;  %v1479_v47 = vpop.f32.mrb[6].mxu1 }
 0x27a   :  { %v1480_v48 = vpop.f32.mrb[7].mxu1 }
 0x27b   :  { %v1104_v49 = vadd.f32 %v1478_v46, %v1430_v44 }
 0x27d   :  { %v1109_v50 = vmax.f32 %v1104_v49, 0.0 }
 0x27f   :  { %v1110_v52 = vpack.c.bf16 %v1109_v50, %v1109_v50 }
 0x281   :  { %1511 = vmatmul.mubr.bf16.vlgmr.msra.gmra.mrb[8].mxu1 %v1110_v52 }
 0x282   :  { %1515 = vmatpush3.bf16.msra.mxu1 %v1743_v51  ;;  %1518 = vmatprep.mubr.msk.bf16.mxu1 %vm1829_vm0, %v1828_v11 }
 0x283   :  { %1516 = vmatprep.subr.bf16.mxu1 %v1828_v11 }
 0x286   :  { %1517 = vmatpush3.bf16.msra.mxu1 %v1744_v54 }
 0x354   :  { %v1213_v56 = vpop.f32.mrb[8].mxu1 }
 0x355   :  { %v1214_v57 = vadd.f32 %v1447_v55, %v1213_v56  ;;  %v1512_v58 = vpop.f32.mrb[9].mxu1 }
 0x356   :  { %v1216_v59 = vpop.f32.mrb[10].mxu1 }
 0x357   :  { %v1219_v60 = vmax.f32 %v1214_v57, 0.0  ;;  %v1513_v61 = vpop.f32.mrb[11].mxu1 }
 0x359   :  { %v1220_v53 = vpack.c.bf16 %v1219_v60, %v1219_v60 }
 0x35b   :  { %1519 = vmatmul.mubr.msk.bf16.vlgmr.msra.gmra.mrb[12].mxu1 %vm1241_vm1, %v1220_v53 }
 0x42e   :  { %v1279_v63 = vpop.f32.mrb[12].mxu1 }
 0x42f   :  { %v1280_v0 = vadd.f32 %v1456_v62, %v1279_v63  ;;  %v1520_v1 = vpop.f32.mrb[13].mxu1 }
 0x430   :  { %v1282_v2 = vpop.f32.mrb[14].mxu1 }
 0x431   :  { %1285 = vmax.xlane.f32.xlu0 %v1280_v0  ;;  %v1521_v3 = vpop.f32.mrb[15].mxu1 }
 0x4be   :  { %v1286_v4 = vpop.xlane.xlu0 %1285 }
 0x4bf   :  { %v1287_v5 = vsub.f32 %v1280_v0, %v1286_v4 }
 0x4c1   :  { %v1288_v6 = vmul.f32 1.442695, %v1287_v5 }
 0x4c3   :  { %1745 = vpow2.f32 %v1288_v6 }
 0x4cd   :  { %v1746_v7 = vpop.eup %1745 }
 0x4ce   :  { %1290 = vadd.xlane.f32.xlu0 %v1746_v7 }
 0x55b   :  { %v1291_v8 = vpop.xlane.xlu0 %1290 }
 0x55c   :  { %1747 = vrcp.f32 %v1291_v8 }
 0x566   :  { %v1748_v9 = vpop.eup %1747 }
 0x567   :  { %v1293_v10 = vmul.f32 %v1748_v9, %v1746_v7 }
 0x569   :  { %1294 = vst [vmem:[#allocation7] sm:$0xff] %v1293_v10 }
 0x56a   :  { %1804 = shalt.err (!%p1801_p6)
}
 0x56b   :  { %s1805_s9 = scalar_lea.hbm %s1986_s6, 128 }
 0x56c   :  { %p1806_p7 = scmp.ne.s32.totalorder %s1986_s6, %s1805_s9  ;;  %p1809_p8 = scmp.lt.u32.totalorder %s1805_s9, %s1986_s6 }
 0x56e   :  { %p1811_p9 = pnand %p1809_p8, %p1806_p7 }
 0x570   :  { %1814 = shalt.err (!%p1811_p9)
}
 0x571   :  { %1304 = dma.vmem_to_hbm [thread:$0]  %s1302_s0, 128, %s1986_s6, [#allocation4]  }
 0x572   :  { %1819 = dma.done.wait [#allocation4], 128  }
 0x573   :  { %1820 = vsyncadd [#allocation4], 4294967168 }
 0x574   :  { %1308 = vsyncpa [#allocation3], 1 }
 0x575   :  { %1309 = vsyncpa [#allocation6], 1 }
 0x576   :  { %1310 = vsyncpa [#allocation4], 1 }

// kernel: tpu_custom_call.1
= control target key start
LH: loop header
LB: loop body
LE: loop exit
PB: predicated region body
PF: predicated region fallthrough
CT: control target
= control target key end

     0   :  { %11 = vsyncpa [#allocation3], 0  ;;  %s1980_s0 = inlined_call_operand.vmem [shape: bf16[8,896], index: 0, kind: input, shape index: {}]   ;;  %s1981_s1 = inlined_call_operand.hbm [shape: bf16[896,256], index: 1, kind: input, shape index: {}]   ;;  %s1982_s2 = inlined_call_operand.hbm [shape: bf16[256,128], index: 2, kind: input, shape index: {}]   ;;  %s1983_s3 = inlined_call_operand.vmem [shape: bf16[128,32], index: 3, kind: input, shape index: {}]   ;;  %s1984_s4 = inlined_call_operand.vmem [shape: bf16[32,128], index: 4, kind: input, shape index: {}]   ;;  %s1985_s5 = inlined_call_operand.vmem [shape: f32[4,256], index: 5, kind: input, shape index: {}]   ;;  %s1986_s6 = inlined_call_operand.hbm [shape: f32[8,128], index: 6, kind: output, shape index: {}]  }
   0x1   :  { %12 = vsyncpa [#allocation6], 0 }
   0x2   :  { %13 = vsyncpa [#allocation4], 0  ;;  %s1821_s21 = smov [#allocation2]   ;;  %s1749_s25 = scalar_lea.hbm %s1981_s1, 14336 }
   0x3   :  { %s21_s22 = sshll.u32 %s1821_s21, 4  ;;  %p1750_p0 = scmp.ne.s32.totalorder %s1981_s1, %s1749_s25  ;;  %s22_s22 = int_to_ptr.vmem [resolvable:$true] %s21_s22 }
   0x4   :  { %p1753_p1 = scmp.lt.u32.totalorder %s1749_s25, %s1981_s1 }
   0x6   :  { %p1755_p2 = pnand %p1753_p1, %p1750_p0 }
   0x8   :  { %1758 = shalt.err (!%p1755_p2)
}
   0x9   :  { %s1759_s30 = scalar_lea.vmem %s22_s22, 14336  ;;  %p1764_p4 = scmp.lt.s32.totalorder %s22_s22, %s22_s22 }
   0xa   :  { %p1760_p3 = scmp.ne.s32.totalorder %s22_s22, %s1759_s30  ;;  %p1765_p5 = scmp.lt.s32.totalorder %s1759_s30, %s1759_s30 }
   0xc   :  { %p1766_p6 = por %p1765_p5, %p1764_p4 }
   0xe   :  { %p1767_p7 = pnand %p1766_p6, %p1760_p3 }
  0x10   :  { %1770 = shalt.err (!%p1767_p7)
}
  0x11   :  { %s1822_s7 = smov 128   ;;  %s1823_s8 = smov 8  }
  0x12   :  { %27 = dma.hbm_to_vmem [thread:$0]  %s1981_s1, 14336, %s22_s22, [#allocation3], %s1822_s7, %s1822_s7, %s1823_s8  }
  0x13   :  { %s1824_s11 = smov [#allocation5]   ;;  %s1771_s15 = scalar_lea.hbm %s1982_s2, 2048 }
  0x14   :  { %s33_s12 = sshll.u32 %s1824_s11, 4  ;;  %p1772_p8 = scmp.ne.s32.totalorder %s1982_s2, %s1771_s15  ;;  %s34_s12 = int_to_ptr.vmem [resolvable:$true] %s33_s12 }
  0x15   :  { %p1775_p9 = scmp.lt.u32.totalorder %s1771_s15, %s1982_s2 }
  0x17   :  { %p1777_p10 = pnand %p1775_p9, %p1772_p8 }
  0x19   :  { %1780 = shalt.err (!%p1777_p10)
}
  0x1a   :  { %s1781_s20 = scalar_lea.vmem %s34_s12, 2048  ;;  %p1786_p12 = scmp.lt.s32.totalorder %s34_s12, %s34_s12 }
  0x1b   :  { %p1782_p11 = scmp.ne.s32.totalorder %s34_s12, %s1781_s20  ;;  %p1787_p13 = scmp.lt.s32.totalorder %s1781_s20, %s1781_s20 }
  0x1d   :  { %p1788_p0 = por %p1787_p13, %p1786_p12 }
  0x1f   :  { %p1789_p1 = pnand %p1788_p0, %p1782_p11 }
  0x21   :  { %1792 = shalt.err (!%p1789_p1)
}
  0x22   :  { %s1825_s1 = smov 64   ;;  %s1826_s21 = smov 4  }
  0x23   :  { %39 = dma.hbm_to_vmem [thread:$0]  %s1982_s2, 2048, %s34_s12, [#allocation6], %s1825_s1, %s1825_s1, %s1826_s21  }
  0x24   :  { %1815 = dma.done.wait [#allocation3], 14336  }
  0x25   :  { %1816 = vsyncadd [#allocation3], 4294952960 }
  0x26   :  { %1817 = dma.done.wait [#allocation6], 2048  }
  0x27   :  { %1818 = vsyncadd [#allocation6], 4294965248  ;;  %v1544_v0 = vld [vmem:[#allocation2 + $0x104] ss:$8 sps:$4 sm:$0xff]   ;;  %v1546_v1 = vld [vmem:[#allocation2 + $0x100] ss:$8 sps:$4 sm:$0xff]  }
  0x28   :  { %810 = vmatprep.subr.bf16.mxu0 %v1544_v0  ;;  %v1547_v2 = vld [vmem:[#allocation2 + $0x114] ss:$8 sps:$4 sm:$0xff]   ;;  %v1549_v3 = vld [vmem:[#allocation2 + $0x110] ss:$8 sps:$4 sm:$0xff]   ;;  %v1550_v4 = vld [vmem:[#allocation2 + $0x124] ss:$8 sps:$4 sm:$0xff]  }
  0x29   :  { %811 = vmatpush1.bf16.msra.mxu0 %v1546_v1  ;;  %v1552_v5 = vld [vmem:[#allocation2 + $0x120] ss:$8 sps:$4 sm:$0xff]   ;;  %v1553_v6 = vld [vmem:[#allocation2 + $0x134] ss:$8 sps:$4 sm:$0xff]   ;;  %v1555_v7 = vld [vmem:[#allocation2 + $0x130] ss:$8 sps:$4 sm:$0xff]  }
  0x2a   :  { %812 = vmatprep.subr.bf16.mxu0 %v1547_v2  ;;  %v1556_v8 = vld [vmem:[#allocation2 + $0x144] ss:$8 sps:$4 sm:$0xff]   ;;  %v1558_v9 = vld [vmem:[#allocation2 + $0x140] ss:$8 sps:$4 sm:$0xff]   ;;  %v1559_v10 = vld [vmem:[#allocation2 + $0x154] ss:$8 sps:$4 sm:$0xff]  }
  0x2b   :  { %v1561_v11 = vld [vmem:[#allocation2 + $0x150] ss:$8 sps:$4 sm:$0xff]   ;;  %v1562_v12 = vld [vmem:[#allocation2 + $0x164] ss:$8 sps:$4 sm:$0xff]   ;;  %v1564_v15 = vld [vmem:[#allocation2 + $0x160] ss:$8 sps:$4 sm:$0xff]  }
  0x2c   :  { %v1893_v13 = vld [vmem:[%s1980_s0 + $0x8] sm:$0xff]  ;;  %v1565_v16 = vld [vmem:[#allocation2 + $0x174] ss:$8 sps:$4 sm:$0xff]   ;;  %v1567_v17 = vld [vmem:[#allocation2 + $0x170] ss:$8 sps:$4 sm:$0xff]   ;;  %vm1829_vm0 = vmmov 0  }
  0x2d   :  { %813 = vmatpush1.bf16.msra.mxu0 %v1549_v3  ;;  %v1314_v14 = vcombine.high %v1893_v13, %v1893_v13  ;;  %v1568_v18 = vld [vmem:[#allocation2 + $0x184] ss:$8 sps:$4 sm:$0xff]   ;;  %v1570_v19 = vld [vmem:[#allocation2 + $0x180] ss:$8 sps:$4 sm:$0xff]   ;;  %v1571_v20 = vld [vmem:[#allocation2 + $0x194] ss:$8 sps:$4 sm:$0xff]   ;;  %v1313_v54 = vcombine.low %v1893_v13, %v1893_v13 }
  0x2e   :  { %814 = vmatprep.subr.bf16.mxu0 %v1550_v4  ;;  %v1615_v21 = vld [vmem:[#allocation2 + $0x4] ss:$8 sps:$4 sm:$0xff]   ;;  %v1617_v22 = vld [vmem:[#allocation2] ss:$8 sps:$4 sm:$0xff]   ;;  %v1621_v23 = vld [vmem:[#allocation2 + $0x14] ss:$8 sps:$4 sm:$0xff]  }
  0x2f   :  { %842 = vmatprep.mubr.bf16.mxu0 %v1314_v14  ;;  %769 = vmatprep.subr.bf16.mxu1 %v1615_v21  ;;  %v1623_v24 = vld [vmem:[#allocation2 + $0x10] ss:$8 sps:$4 sm:$0xff]   ;;  %v1574_v26 = vld [vmem:[#allocation2 + $0x1a4] ss:$8 sps:$4 sm:$0xff]   ;;  %v1576_v28 = vld [vmem:[#allocation2 + $0x1a0] ss:$8 sps:$4 sm:$0xff]  }
  0x30   :  { %770 = vmatpush1.bf16.msra.mxu1 %v1617_v22  ;;  %v1573_v25 = vld [vmem:[#allocation2 + $0x190] ss:$8 sps:$4 sm:$0xff]   ;;  %v1627_v27 = vld [vmem:[#allocation2 + $0x24] ss:$8 sps:$4 sm:$0xff]   ;;  %v1629_v29 = vld [vmem:[#allocation2 + $0x20] ss:$8 sps:$4 sm:$0xff]  }
  0x31   :  { %815 = vmatpush1.bf16.msra.mxu0 %v1552_v5  ;;  %771 = vmatprep.subr.bf16.mxu1 %v1621_v23  ;;  %v1633_v30 = vld [vmem:[#allocation2 + $0x34] ss:$8 sps:$4 sm:$0xff]   ;;  %v1579_v32 = vld [vmem:[#allocation2 + $0x1b0] ss:$8 sps:$4 sm:$0xff]   ;;  %v1639_v34 = vld [vmem:[#allocation2 + $0x44] ss:$8 sps:$4 sm:$0xff]  }
  0x32   :  { %816 = vmatprep.subr.bf16.mxu0 %v1553_v6  ;;  %v1577_v31 = vld [vmem:[#allocation2 + $0x1b4] ss:$8 sps:$4 sm:$0xff]   ;;  %v1635_v33 = vld [vmem:[#allocation2 + $0x30] ss:$8 sps:$4 sm:$0xff]   ;;  %v1580_v35 = vld [vmem:[#allocation2 + $0x1c4] ss:$8 sps:$4 sm:$0xff]  }
  0x33   :  { %v1582_v36 = vld [vmem:[#allocation2 + $0x1c0] ss:$8 sps:$4 sm:$0xff]   ;;  %v1645_v38 = vld [vmem:[#allocation2 + $0x54] ss:$8 sps:$4 sm:$0xff]   ;;  %v1585_v40 = vld [vmem:[#allocation2 + $0x1d0] ss:$8 sps:$4 sm:$0xff]  }
  0x34   :  { %772 = vmatpush1.bf16.msra.mxu1 %v1623_v24  ;;  %v1641_v37 = vld [vmem:[#allocation2 + $0x40] ss:$8 sps:$4 sm:$0xff]   ;;  %v1583_v39 = vld [vmem:[#allocation2 + $0x1d4] ss:$8 sps:$4 sm:$0xff]   ;;  %v1647_v41 = vld [vmem:[#allocation2 + $0x50] ss:$8 sps:$4 sm:$0xff]  }
  0x35   :  { %817 = vmatpush1.bf16.msra.mxu0 %v1555_v7  ;;  %773 = vmatprep.subr.bf16.mxu1 %v1627_v27  ;;  %v1651_v42 = vld [vmem:[#allocation2 + $0x64] ss:$8 sps:$4 sm:$0xff]   ;;  %v1588_v44 = vld [vmem:[#allocation2 + $0x1e0] ss:$8 sps:$4 sm:$0xff]   ;;  %v1657_v46 = vld [vmem:[#allocation2 + $0x74] ss:$8 sps:$4 sm:$0xff]  }
  0x36   :  { %818 = vmatprep.subr.bf16.mxu0 %v1556_v8  ;;  %v1586_v43 = vld [vmem:[#allocation2 + $0x1e4] ss:$8 sps:$4 sm:$0xff]   ;;  %v1653_v45 = vld [vmem:[#allocation2 + $0x60] ss:$8 sps:$4 sm:$0xff]   ;;  %v1589_v47 = vld [vmem:[#allocation2 + $0x1f4] ss:$8 sps:$4 sm:$0xff]  }
  0x37   :  { %v1591_v48 = vld [vmem:[#allocation2 + $0x1f0] ss:$8 sps:$4 sm:$0xff]   ;;  %v1663_v50 = vld [vmem:[#allocation2 + $0x84] ss:$8 sps:$4 sm:$0xff]   ;;  %v1594_v52 = vld [vmem:[#allocation2 + $0x200] ss:$8 sps:$4 sm:$0xff]  }
  0x38   :  { %774 = vmatpush1.bf16.msra.mxu1 %v1629_v29  ;;  %v1659_v49 = vld [vmem:[#allocation2 + $0x70] ss:$8 sps:$4 sm:$0xff]   ;;  %v1596_v51 = vld [vmem:[#allocation2 + $0x204] ss:$8 sps:$4 sm:$0xff]   ;;  %v1665_v55 = vld [vmem:[#allocation2 + $0x80] ss:$8 sps:$4 sm:$0xff]  }
  0x39   :  { %819 = vmatpush1.bf16.msra.mxu0 %v1558_v9  ;;  %775 = vmatprep.subr.bf16.mxu1 %v1633_v30  ;;  %v1900_v53 = vld [vmem:[%s1980_s0 + $0x10] sm:$0xff]  ;;  %v1677_v61 = vld [vmem:[#allocation2 + $0xa4] ss:$8 sps:$4 sm:$0xff]   ;;  %v1600_v63 = vld [vmem:[#allocation2 + $0x220] ss:$8 sps:$4 sm:$0xff]   ;;  %vm1241_vm1 = vcmask 261120  }
  0x3a   :  { %820 = vmatprep.subr.bf16.mxu0 %v1559_v10  ;;  %v1669_v56 = vld [vmem:[#allocation2 + $0x94] ss:$8 sps:$4 sm:$0xff]   ;;  %v1316_v58 = vcombine.high %v1900_v53, %v1900_v53  ;;  %v1597_v59 = vld [vmem:[#allocation2 + $0x210] ss:$8 sps:$4 sm:$0xff]   ;;  %v1602_v62 = vld [vmem:[#allocation2 + $0x224] ss:$8 sps:$4 sm:$0xff]  }
  0x3b   :  { %v1599_v57 = vld [vmem:[#allocation2 + $0x214] ss:$8 sps:$4 sm:$0xff]   ;;  %v1671_v60 = vld [vmem:[#allocation2 + $0x90] ss:$8 sps:$4 sm:$0xff]   ;;  %v1679_v0 = vld [vmem:[#allocation2 + $0xa0] ss:$8 sps:$4 sm:$0xff]  }
  0x3c   :  { %776 = vmatpush1.bf16.msra.mxu1 %v1635_v33  ;;  %v1683_v1 = vld [vmem:[#allocation2 + $0xb4] ss:$8 sps:$4 sm:$0xff]   ;;  %v1685_v3 = vld [vmem:[#allocation2 + $0xb0] ss:$8 sps:$4 sm:$0xff]   ;;  %v57_v4 = vld [vmem:[%s1980_s0] sm:$0xff] }
  0x3d   :  { %821 = vmatpush1.bf16.msra.mxu0 %v1561_v11  ;;  %777 = vmatprep.subr.bf16.mxu1 %v1639_v34  ;;  %v1605_v2 = vld [vmem:[#allocation2 + $0x234] ss:$8 sps:$4 sm:$0xff]   ;;  %v1603_v5 = vld [vmem:[#allocation2 + $0x230] ss:$8 sps:$4 sm:$0xff]   ;;  %v1689_v6 = vld [vmem:[#allocation2 + $0xc4] ss:$8 sps:$4 sm:$0xff]   ;;  %v1312_v7 = vcombine.high %v57_v4, %v57_v4  ;;  %v1311_v27 = vcombine.low %v57_v4, %v57_v4 }
  0x3e   :  { %822 = vmatprep.subr.bf16.mxu0 %v1562_v12  ;;  %v1608_v8 = vld [vmem:[#allocation2 + $0x244] ss:$8 sps:$4 sm:$0xff]   ;;  %v1606_v9 = vld [vmem:[#allocation2 + $0x240] ss:$8 sps:$4 sm:$0xff]   ;;  %v1695_v11 = vld [vmem:[#allocation2 + $0xd4] ss:$8 sps:$4 sm:$0xff]  }
  0x3f   :  { %801 = vmatprep.mubr.bf16.mxu1 %v1312_v7  ;;  %v1691_v10 = vld [vmem:[#allocation2 + $0xc0] ss:$8 sps:$4 sm:$0xff]   ;;  %v1611_v12 = vld [vmem:[#allocation2 + $0x254] ss:$8 sps:$4 sm:$0xff]   ;;  %v1609_v13 = vld [vmem:[#allocation2 + $0x250] ss:$8 sps:$4 sm:$0xff]  }
  0x40   :  { %778 = vmatpush1.bf16.msra.mxu1 %v1641_v37  ;;  %v1697_v14 = vld [vmem:[#allocation2 + $0xd0] ss:$8 sps:$4 sm:$0xff]   ;;  %v1719_v23 = vld [vmem:[#allocation5 + $0x40] sm:$0xff]   ;;  %v1632_v29 = vld [vmem:[#allocation2 + $0x294] ss:$8 sps:$4 sm:$0xff]  }
  0x41   :  { %823 = vmatpush1.bf16.msra.mxu0 %v1564_v15  ;;  %779 = vmatprep.subr.bf16.mxu1 %v1645_v38  ;;  %v1701_v15 = vld [vmem:[#allocation2 + $0xe4] ss:$8 sps:$4 sm:$0xff]   ;;  %v1709_v21 = vld [vmem:[#allocation2 + $0xf0] ss:$8 sps:$4 sm:$0xff]   ;;  %v1644_v37 = vld [vmem:[#allocation2 + $0x2b4] ss:$8 sps:$4 sm:$0xff]  }
  0x42   :  { %824 = vmatprep.subr.bf16.mxu0 %v1565_v16  ;;  %v1614_v16 = vld [vmem:[#allocation2 + $0x264] ss:$8 sps:$4 sm:$0xff]   ;;  %v1618_v22 = vld [vmem:[#allocation2 + $0x270] ss:$8 sps:$4 sm:$0xff]  }
  0x43   :  { %v1626_v24 = vld [vmem:[#allocation2 + $0x284] ss:$8 sps:$4 sm:$0xff]   ;;  %v1724_v34 = vld [vmem:[#allocation5 + $0x10] sm:$0xff]   ;;  %v1726_v38 = vld [vmem:[#allocation5 + $0x18] sm:$0xff]  }
  0x44   :  { %780 = vmatpush1.bf16.msra.mxu1 %v1647_v41  ;;  %v1722_v30 = vld [vmem:[#allocation5 + $0x8] sm:$0xff]   ;;  %v1718_v4 = vld [vmem:[%s1980_s0 + $0x18] ss:$0 sps:$4 sm:$0xff]   ;;  %v1731_v7 = vld [vmem:[#allocation5 + $0x70] sm:$0xff]  }
  0x45   :  { %825 = vmatpush1.bf16.msra.mxu0 %v1567_v17  ;;  %781 = vmatprep.subr.bf16.mxu1 %v1651_v42  ;;  %v1612_v17 = vld [vmem:[#allocation2 + $0x260] ss:$8 sps:$4 sm:$0xff]   ;;  %v1638_v33 = vld [vmem:[#allocation2 + $0x2a4] ss:$8 sps:$4 sm:$0xff]  }
  0x46   :  { %826 = vmatprep.subr.bf16.mxu0 %v1568_v18  ;;  %v1620_v18 = vld [vmem:[#allocation2 + $0x274] ss:$8 sps:$4 sm:$0xff]   ;;  %v1650_v41 = vld [vmem:[#allocation2 + $0x2c4] ss:$8 sps:$4 sm:$0xff]  }
  0x47   :  { %v1728_v42 = vld [vmem:[#allocation5 + $0x20] sm:$0xff]  }
  0x48   :  { %782 = vmatpush1.bf16.msra.mxu1 %v1653_v45  ;;  %v1654_v45 = vld [vmem:[#allocation2 + $0x2d0] ss:$8 sps:$4 sm:$0xff]  }
  0x49   :  { %827 = vmatpush1.bf16.msra.mxu0 %v1570_v19  ;;  %783 = vmatprep.subr.bf16.mxu1 %v1657_v46  ;;  %v1703_v19 = vld [vmem:[#allocation2 + $0xe0] ss:$8 sps:$4 sm:$0xff]   ;;  %v1662_v46 = vld [vmem:[#allocation2 + $0x2e4] ss:$8 sps:$4 sm:$0xff]  }
  0x4a   :  { %828 = vmatprep.subr.bf16.mxu0 %v1571_v20  ;;  %v1707_v20 = vld [vmem:[#allocation2 + $0xf4] ss:$8 sps:$4 sm:$0xff]  }
  0x4c   :  { %784 = vmatpush1.bf16.msra.mxu1 %v1659_v49  ;;  %v1666_v49 = vld [vmem:[#allocation2 + $0x2f0] ss:$8 sps:$4 sm:$0xff]  }
  0x4d   :  { %829 = vmatpush1.bf16.msra.mxu0 %v1573_v25  ;;  %785 = vmatprep.subr.bf16.mxu1 %v1663_v50  ;;  %v1720_v25 = vld [vmem:[#allocation5] sm:$0xff]  }
  0x4e   :  { %830 = vmatprep.subr.bf16.mxu0 %v1574_v26  ;;  %v1624_v26 = vld [vmem:[#allocation2 + $0x280] ss:$8 sps:$4 sm:$0xff]   ;;  %v1676_v50 = vld [vmem:[#allocation2 + $0x304] ss:$8 sps:$4 sm:$0xff]  }
  0x50   :  { %786 = vmatpush1.bf16.msra.mxu1 %v1665_v55  ;;  %v1680_v55 = vld [vmem:[#allocation2 + $0x310] ss:$8 sps:$4 sm:$0xff]  }
  0x51   :  { %831 = vmatpush1.bf16.msra.mxu0 %v1576_v28  ;;  %787 = vmatprep.subr.bf16.mxu1 %v1669_v56  ;;  %v1721_v28 = vld [vmem:[#allocation5 + $0x48] sm:$0xff]   ;;  %v1827_v56 = vmov 0  }
  0x52   :  { %832 = vmatprep.subr.bf16.mxu0 %v1577_v31  ;;  %v1630_v31 = vld [vmem:[#allocation2 + $0x290] ss:$8 sps:$4 sm:$0xff]  }
  0x54   :  { %788 = vmatpush1.bf16.msra.mxu1 %v1671_v60  ;;  %v1692_v60 = vld [vmem:[#allocation2 + $0x330] ss:$8 sps:$4 sm:$0xff]  }
  0x55   :  { %833 = vmatpush1.bf16.msra.mxu0 %v1579_v32  ;;  %789 = vmatprep.subr.bf16.mxu1 %v1677_v61  ;;  %v1723_v32 = vld [vmem:[#allocation5 + $0x50] sm:$0xff]   ;;  %v1700_v61 = vld [vmem:[#allocation2 + $0x344] ss:$8 sps:$4 sm:$0xff]  }
  0x56   :  { %834 = vmatprep.subr.bf16.mxu0 %v1580_v35  ;;  %v1636_v35 = vld [vmem:[#allocation2 + $0x2a0] ss:$8 sps:$4 sm:$0xff]  }
  0x58   :  { %790 = vmatpush1.bf16.msra.mxu1 %v1679_v0  ;;  %v1712_v0 = vld [vmem:[#allocation2 + $0x364] ss:$8 sps:$4 sm:$0xff]  }
  0x59   :  { %835 = vmatpush1.bf16.msra.mxu0 %v1582_v36  ;;  %791 = vmatprep.subr.bf16.mxu1 %v1683_v1  ;;  %v1725_v36 = vld [vmem:[#allocation5 + $0x58] sm:$0xff]   ;;  %v1710_v1 = vld [vmem:[#allocation2 + $0x360] ss:$8 sps:$4 sm:$0xff]  }
  0x5a   :  { %836 = vmatprep.subr.bf16.mxu0 %v1583_v39  ;;  %v1642_v39 = vld [vmem:[#allocation2 + $0x2b0] ss:$8 sps:$4 sm:$0xff]  }
  0x5c   :  { %792 = vmatpush1.bf16.msra.mxu1 %v1685_v3  ;;  %v1715_v3 = vld [vmem:[#allocation2 + $0x370] ss:$8 sps:$4 sm:$0xff]  }
  0x5d   :  { %837 = vmatpush1.bf16.msra.mxu0 %v1585_v40  ;;  %793 = vmatprep.subr.bf16.mxu1 %v1689_v6  ;;  %v1727_v40 = vld [vmem:[#allocation5 + $0x60] sm:$0xff]   ;;  %v1730_v6 = vld [vmem:[#allocation5 + $0x28] sm:$0xff]  }
  0x5e   :  { %838 = vmatprep.subr.bf16.mxu0 %v1586_v43  ;;  %v1648_v43 = vld [vmem:[#allocation2 + $0x2c0] ss:$8 sps:$4 sm:$0xff]  }
  0x60   :  { %794 = vmatpush1.bf16.msra.mxu1 %v1691_v10  ;;  %v1734_v10 = vld [vmem:[#allocation5 + $0x38] sm:$0xff]  }
  0x61   :  { %839 = vmatpush1.bf16.msra.mxu0 %v1588_v44  ;;  %795 = vmatprep.subr.bf16.mxu1 %v1695_v11  ;;  %v1656_v44 = vld [vmem:[#allocation2 + $0x2d4] ss:$8 sps:$4 sm:$0xff]   ;;  %v1828_v11 = vmov 0.0  }
  0x62   :  { %840 = vmatprep.subr.bf16.mxu0 %v1589_v47  ;;  %v1660_v47 = vld [vmem:[#allocation2 + $0x2e0] ss:$8 sps:$4 sm:$0xff]  }
  0x64   :  { %796 = vmatpush1.bf16.msra.mxu1 %v1697_v14 }
  0x65   :  { %841 = vmatpush1.bf16.msra.mxu0 %v1591_v48  ;;  %797 = vmatprep.subr.bf16.mxu1 %v1701_v15  ;;  %v1668_v48 = vld [vmem:[#allocation2 + $0x2f4] ss:$8 sps:$4 sm:$0xff]  }
  0x66   :  { %851 = vmatprep.subr.bf16.mxu0 %v1596_v51  ;;  %v1315_v51 = vcombine.low %v1900_v53, %v1900_v53  ;;  %v1698_v53 = vld [vmem:[#allocation2 + $0x340] ss:$8 sps:$4 sm:$0xff]  }
  0x68   :  { %843 = vmatmul.mubr.bf16.vlgmr.msra.gmra.mrb[0].mxu0 %v1313_v54  ;;  %798 = vmatpush1.bf16.msra.mxu1 %v1703_v19  ;;  %v1682_v54 = vld [vmem:[#allocation2 + $0x314] ss:$8 sps:$4 sm:$0xff]   ;;  %v53_v19 = vld [vmem:[%s1985_s5] ss:$4 sm:$0x3] }
  0x69   :  { %852 = vmatpush1.bf16.msra.mxu0 %v1594_v52  ;;  %883 = vmatprep.mubr.bf16.mxu0 %v1316_v58  ;;  %v1674_v52 = vld [vmem:[#allocation2 + $0x300] ss:$8 sps:$4 sm:$0xff]  }
  0x6a   :  { %853 = vmatprep.subr.bf16.mxu0 %v1599_v57  ;;  %799 = vmatprep.subr.bf16.mxu1 %v1707_v20  ;;  %v1688_v57 = vld [vmem:[#allocation2 + $0x324] ss:$8 sps:$4 sm:$0xff]   ;;  %v1686_v58 = vld [vmem:[#allocation2 + $0x320] ss:$8 sps:$4 sm:$0xff]  }
  0x6c   :  { %800 = vmatpush1.bf16.msra.mxu1 %v1709_v21 }
  0x6d   :  { %854 = vmatpush1.bf16.msra.mxu0 %v1597_v59  ;;  %1460 = vmatprep.subr.bf16.mxu1 %v1719_v23  ;;  %v1694_v59 = vld [vmem:[#allocation2 + $0x334] ss:$8 sps:$4 sm:$0xff]  }
  0x6e   :  { %855 = vmatprep.subr.bf16.mxu0 %v1602_v62  ;;  %v1706_v62 = vld [vmem:[#allocation2 + $0x354] ss:$8 sps:$4 sm:$0xff]  }
  0x6f   :  { %802 = vmatmul.mubr.bf16.vlgmr.msra.gmra.mrb[0].mxu1 %v1311_v27 }
  0x70   :  { %1461 = vmatpush3.bf16.msra.mxu1 %v1720_v25 }
  0x71   :  { %856 = vmatpush1.bf16.msra.mxu0 %v1600_v63  ;;  %1462 = vmatprep.subr.bf16.mxu1 %v1721_v28  ;;  %v1704_v63 = vld [vmem:[#allocation2 + $0x350] ss:$8 sps:$4 sm:$0xff]  }
  0x72   :  { %857 = vmatprep.subr.bf16.mxu0 %v1605_v2  ;;  %v1717_v2 = vld [vmem:[#allocation2 + $0x374] ss:$8 sps:$4 sm:$0xff]  }
  0x74   :  { %1463 = vmatpush3.bf16.msra.mxu1 %v1722_v30 }
  0x75   :  { %858 = vmatpush1.bf16.msra.mxu0 %v1603_v5  ;;  %1464 = vmatprep.subr.bf16.mxu1 %v1723_v32  ;;  %v1729_v5 = vld [vmem:[#allocation5 + $0x68] sm:$0xff]  }
  0x76   :  { %859 = vmatprep.subr.bf16.mxu0 %v1608_v8  ;;  %v1732_v8 = vld [vmem:[#allocation5 + $0x30] sm:$0xff]  }
  0x78   :  { %1465 = vmatpush3.bf16.msra.mxu1 %v1724_v34  ;;  %v1735_v34 = vld [vmem:[%s1983_s3] sm:$0xff]  }
  0x79   :  { %860 = vmatpush1.bf16.msra.mxu0 %v1606_v9  ;;  %1466 = vmatprep.subr.bf16.mxu1 %v1725_v36  ;;  %v1733_v9 = vld [vmem:[#allocation5 + $0x78] sm:$0xff]   ;;  %v1736_v36 = vld [vmem:[%s1983_s3 + $0x8] sm:$0xff]  }
  0x7a   :  { %861 = vmatprep.subr.bf16.mxu0 %v1611_v12 }
  0x7c   :  { %1467 = vmatpush3.bf16.msra.mxu1 %v1726_v38  ;;  %v1738_v38 = vld [vmem:[%s1983_s3 + $0x18] sm:$0xff]  }
  0x7d   :  { %862 = vmatpush1.bf16.msra.mxu0 %v1609_v13  ;;  %1468 = vmatprep.subr.bf16.mxu1 %v1727_v40  ;;  %v1740_v40 = vld [vmem:[%s1983_s3 + $0x28] sm:$0xff]  }
  0x7e   :  { %863 = vmatprep.subr.bf16.mxu0 %v1614_v16  ;;  %v174_v16 = vlaneseq }
  0x80   :  { %1469 = vmatpush3.bf16.msra.mxu1 %v1728_v42  ;;  %v1742_v42 = vld [vmem:[%s1983_s3 + $0x38] sm:$0xff]  }
  0x81   :  { %864 = vmatpush1.bf16.msra.mxu0 %v1612_v17  ;;  %1470 = vmatprep.subr.bf16.mxu1 %v1729_v5  ;;  %v175_v17 = vshrl.u32 %v174_v16, 7 }
  0x82   :  { %865 = vmatprep.subr.bf16.mxu0 %v1620_v18 }
  0x83   :  { %v176_v18 = vsub.s32 0, %v175_v17  ;;  %v180_v20 = vsub.s32 1, %v175_v17 }
  0x84   :  { %1471 = vmatpush3.bf16.msra.mxu1 %v1730_v6 }
  0x85   :  { %866 = vmatpush1.bf16.msra.mxu0 %v1618_v22  ;;  %1472 = vmatprep.subr.bf16.mxu1 %v1731_v7  ;;  %v177_v21 = vrot.slane %v53_v19, %v176_v18  ;;  %v181_v22 = vrot.slane %v53_v19, %v180_v20 }
  0x86   :  { %867 = vmatprep.subr.bf16.mxu0 %v1626_v24 }
  0x88   :  { %1473 = vmatpush3.bf16.msra.mxu1 %v1732_v8 }
  0x89   :  { %868 = vmatpush1.bf16.msra.mxu0 %v1624_v26  ;;  %1474 = vmatprep.subr.bf16.mxu1 %v1733_v9 }
  0x8a   :  { %869 = vmatprep.subr.bf16.mxu0 %v1632_v29 }
  0x8c   :  { %1475 = vmatpush3.bf16.msra.mxu1 %v1734_v10 }
  0x8d   :  { %870 = vmatpush1.bf16.msra.mxu0 %v1630_v31  ;;  %1494 = vmatprep.subr.bf16.mxu1 %v1828_v11 }
  0x8e   :  { %871 = vmatprep.subr.bf16.mxu0 %v1638_v33 }
  0x91   :  { %872 = vmatpush1.bf16.msra.mxu0 %v1636_v35 }
  0x92   :  { %873 = vmatprep.subr.bf16.mxu0 %v1644_v37  ;;  %v1737_v37 = vld [vmem:[%s1983_s3 + $0x10] sm:$0xff]  }
  0x95   :  { %874 = vmatpush1.bf16.msra.mxu0 %v1642_v39  ;;  %v1739_v39 = vld [vmem:[%s1983_s3 + $0x20] sm:$0xff]  }
  0x96   :  { %875 = vmatprep.subr.bf16.mxu0 %v1650_v41  ;;  %v1741_v41 = vld [vmem:[%s1983_s3 + $0x30] sm:$0xff]  }
  0x99   :  { %876 = vmatpush1.bf16.msra.mxu0 %v1648_v43 }
  0x9a   :  { %877 = vmatprep.subr.bf16.mxu0 %v1656_v44  ;;  %v1430_v44 = vld [vmem:[%s1985_s5 + $0x1] ss:$0 sm:$0xff] }
  0x9d   :  { %878 = vmatpush1.bf16.msra.mxu0 %v1654_v45 }
  0x9e   :  { %879 = vmatprep.subr.bf16.mxu0 %v1662_v46 }
  0xa1   :  { %880 = vmatpush1.bf16.msra.mxu0 %v1660_v47 }
  0xa2   :  { %881 = vmatprep.subr.bf16.mxu0 %v1668_v48 }
  0xa5   :  { %882 = vmatpush1.bf16.msra.mxu0 %v1666_v49 }
  0xa6   :  { %892 = vmatprep.subr.bf16.mxu0 %v1676_v50 }
  0xa8   :  { %884 = vmatmul.mubr.bf16.vlgmr.msra.gmra.mrb[0].mxu0 %v1315_v51  ;;  %v1743_v51 = vld [vmem:[%s1984_s4] sm:$0xff]  }
  0xa9   :  { %893 = vmatpush1.bf16.msra.mxu0 %v1674_v52  ;;  %924 = vmatprep.mubr.bf16.mxu0 %v1827_v56 }
  0xaa   :  { %894 = vmatprep.subr.bf16.mxu0 %v1682_v54  ;;  %v1744_v54 = vld [vmem:[%s1984_s4 + $0x8] sm:$0xff]   ;;  %s1830_s4 = smov [#allocation7]  }
  0xab   :  { %s1301_s0 = sshll.u32 %s1830_s4, 4  ;;  %s1302_s0 = int_to_ptr.vmem [resolvable:$true] %s1301_s0 }
  0xac   :  { %p1798_p3 = scmp.lt.s32.totalorder %s1302_s0, %s1302_s0 }
  0xad   :  { %895 = vmatpush1.bf16.msra.mxu0 %v1680_v55  ;;  %v1447_v55 = vld [vmem:[%s1985_s5 + $0x2] ss:$0 sm:$0xff] }
  0xae   :  { %896 = vmatprep.subr.bf16.mxu0 %v1688_v57 }
  0xb1   :  { %897 = vmatpush1.bf16.msra.mxu0 %v1686_v58 }
  0xb2   :  { %898 = vmatprep.subr.bf16.mxu0 %v1694_v59 }
  0xb5   :  { %899 = vmatpush1.bf16.msra.mxu0 %v1692_v60 }
  0xb6   :  { %900 = vmatprep.subr.bf16.mxu0 %v1700_v61 }
  0xb9   :  { %901 = vmatpush1.bf16.msra.mxu0 %v1698_v53 }
  0xba   :  { %902 = vmatprep.subr.bf16.mxu0 %v1706_v62  ;;  %v1456_v62 = vld [vmem:[%s1985_s5 + $0x3] ss:$0 sm:$0xff]  ;;  %s1793_s5 = scalar_lea.vmem %s1302_s0, 128 }
  0xbb   :  { %p1794_p2 = scmp.ne.s32.totalorder %s1302_s0, %s1793_s5  ;;  %p1799_p4 = scmp.lt.s32.totalorder %s1793_s5, %s1793_s5 }
  0xbd   :  { %903 = vmatpush1.bf16.msra.mxu0 %v1704_v63  ;;  %p1800_p5 = por %p1799_p4, %p1798_p3 }
  0xbe   :  { %904 = vmatprep.subr.bf16.mxu0 %v1712_v0 }
  0xbf   :  { %p1801_p6 = pnand %p1800_p5, %p1794_p2 }
  0xc1   :  { %905 = vmatpush1.bf16.msra.mxu0 %v1710_v1 }
  0xc2   :  { %906 = vmatprep.subr.bf16.mxu0 %v1717_v2 }
  0xc5   :  { %907 = vmatpush1.bf16.msra.mxu0 %v1715_v3 }
  0xc8   :  { %925 = vmatmul.mubr.bf16.vlgmr.msra.gmra.mrb[0].mxu0 %v1718_v4 }
 0x142   :  { %v803_v12 = vpop.f32.mrb[0].mxu1 }
 0x143   :  { %v805_v13 = vpop.f32.mrb[1].mxu1  ;;  %v804_v23 = vadd.f32 %v803_v12, %v177_v21 }
 0x144   :  { %v807_v14 = vpop.f32.mrb[2].mxu1  ;;  %v806_v24 = vadd.f32 %v805_v13, %v181_v22 }
 0x145   :  { %v808_v15 = vpop.f32.mrb[3].mxu1 }
 0x19b   :  { %v926_v25 = vpop.f32.mrb[0].mxu0 }
 0x19c   :  { %v1523_v26 = vadd.f32 %v926_v25, %v804_v23  ;;  %v928_v27 = vpop.f32.mrb[1].mxu0 }
 0x19d   :  { %v1525_v28 = vadd.f32 %v928_v27, %v806_v24  ;;  %v930_v29 = vpop.f32.mrb[2].mxu0 }
 0x19e   :  { %v933_v30 = vmax.f32 %v1523_v26, 0.0  ;;  %v931_v31 = vpop.f32.mrb[3].mxu0 }
 0x19f   :  { %v934_v32 = vmax.f32 %v1525_v28, 0.0 }
 0x1a0   :  { %v935_v35 = vpack.c.bf16 %v933_v30, %v933_v30 }
 0x1a1   :  { %v936_v33 = vpack.c.bf16 %v934_v32, %v934_v32 }
 0x1a3   :  { %1101 = vmatprep.mubr.bf16.mxu1 %v936_v33 }
 0x1a4   :  { %1102 = vmatmul.mubr.bf16.vlgmr.msra.gmra.mrb[4].mxu1 %v935_v35 }
 0x1a5   :  { %1495 = vmatpush3.bf16.msra.mxu1 %v1735_v34  ;;  %1510 = vmatprep.mubr.msk.bf16.mxu1 %vm1829_vm0, %v1828_v11 }
 0x1a6   :  { %1496 = vmatprep.subr.bf16.mxu1 %v1828_v11 }
 0x1a9   :  { %1497 = vmatpush3.bf16.msra.mxu1 %v1736_v36 }
 0x1aa   :  { %1498 = vmatprep.subr.bf16.mxu1 %v1828_v11 }
 0x1ad   :  { %1499 = vmatpush3.bf16.msra.mxu1 %v1737_v37 }
 0x1ae   :  { %1500 = vmatprep.subr.bf16.mxu1 %v1828_v11 }
 0x1b1   :  { %1501 = vmatpush3.bf16.msra.mxu1 %v1738_v38 }
 0x1b2   :  { %1502 = vmatprep.subr.bf16.mxu1 %v1828_v11 }
 0x1b5   :  { %1503 = vmatpush3.bf16.msra.mxu1 %v1739_v39 }
 0x1b6   :  { %1504 = vmatprep.subr.bf16.mxu1 %v1828_v11 }
 0x1b9   :  { %1505 = vmatpush3.bf16.msra.mxu1 %v1740_v40 }
 0x1ba   :  { %1506 = vmatprep.subr.bf16.mxu1 %v1828_v11 }
 0x1bd   :  { %1507 = vmatpush3.bf16.msra.mxu1 %v1741_v41 }
 0x1be   :  { %1508 = vmatprep.subr.bf16.mxu1 %v1828_v11 }
 0x1c1   :  { %1509 = vmatpush3.bf16.msra.mxu1 %v1742_v42 }
 0x1c2   :  { %1514 = vmatprep.subr.bf16.mxu1 %v1828_v11 }
 0x277   :  { %v1476_v43 = vpop.f32.mrb[4].mxu1 }
 0x278   :  { %v1477_v45 = vpop.f32.mrb[5].mxu1 }
 0x279   :  { %v1478_v46 = vadd.f32 %v1477_v45, %v1476_v43  ;;  %v1479_v47 = vpop.f32.mrb[6].mxu1 }
 0x27a   :  { %v1480_v48 = vpop.f32.mrb[7].mxu1 }
 0x27b   :  { %v1104_v49 = vadd.f32 %v1478_v46, %v1430_v44 }
 0x27d   :  { %v1109_v50 = vmax.f32 %v1104_v49, 0.0 }
 0x27f   :  { %v1110_v52 = vpack.c.bf16 %v1109_v50, %v1109_v50 }
 0x281   :  { %1511 = vmatmul.mubr.bf16.vlgmr.msra.gmra.mrb[8].mxu1 %v1110_v52 }
 0x282   :  { %1515 = vmatpush3.bf16.msra.mxu1 %v1743_v51  ;;  %1518 = vmatprep.mubr.msk.bf16.mxu1 %vm1829_vm0, %v1828_v11 }
 0x283   :  { %1516 = vmatprep.subr.bf16.mxu1 %v1828_v11 }
 0x286   :  { %1517 = vmatpush3.bf16.msra.mxu1 %v1744_v54 }
 0x354   :  { %v1213_v56 = vpop.f32.mrb[8].mxu1 }
 0x355   :  { %v1214_v57 = vadd.f32 %v1447_v55, %v1213_v56  ;;  %v1512_v58 = vpop.f32.mrb[9].mxu1 }
 0x356   :  { %v1216_v59 = vpop.f32.mrb[10].mxu1 }
 0x357   :  { %v1219_v60 = vmax.f32 %v1214_v57, 0.0  ;;  %v1513_v61 = vpop.f32.mrb[11].mxu1 }
 0x359   :  { %v1220_v53 = vpack.c.bf16 %v1219_v60, %v1219_v60 }
 0x35b   :  { %1519 = vmatmul.mubr.msk.bf16.vlgmr.msra.gmra.mrb[12].mxu1 %vm1241_vm1, %v1220_v53 }
 0x42e   :  { %v1279_v63 = vpop.f32.mrb[12].mxu1 }
 0x42f   :  { %v1280_v0 = vadd.f32 %v1456_v62, %v1279_v63  ;;  %v1520_v1 = vpop.f32.mrb[13].mxu1 }
 0x430   :  { %v1282_v2 = vpop.f32.mrb[14].mxu1 }
 0x431   :  { %1285 = vmax.xlane.f32.xlu0 %v1280_v0  ;;  %v1521_v3 = vpop.f32.mrb[15].mxu1 }
 0x4be   :  { %v1286_v4 = vpop.xlane.xlu0 %1285 }
 0x4bf   :  { %v1287_v5 = vsub.f32 %v1280_v0, %v1286_v4 }
 0x4c1   :  { %v1288_v6 = vmul.f32 1.442695, %v1287_v5 }
 0x4c3   :  { %1745 = vpow2.f32 %v1288_v6 }
 0x4cd   :  { %v1746_v7 = vpop.eup %1745 }
 0x4ce   :  { %1290 = vadd.xlane.f32.xlu0 %v1746_v7 }
 0x55b   :  { %v1291_v8 = vpop.xlane.xlu0 %1290 }
 0x55c   :  { %1747 = vrcp.f32 %v1291_v8 }
 0x566   :  { %v1748_v9 = vpop.eup %1747 }
 0x567   :  { %v1293_v10 = vmul.f32 %v1748_v9, %v1746_v7 }
 0x569   :  { %1294 = vst [vmem:[#allocation7] sm:$0xff] %v1293_v10 }
 0x56a   :  { %1804 = shalt.err (!%p1801_p6)
}
 0x56b   :  { %s1805_s9 = scalar_lea.hbm %s1986_s6, 128 }
 0x56c   :  { %p1806_p7 = scmp.ne.s32.totalorder %s1986_s6, %s1805_s9  ;;  %p1809_p8 = scmp.lt.u32.totalorder %s1805_s9, %s1986_s6 }
 0x56e   :  { %p1811_p9 = pnand %p1809_p8, %p1806_p7 }
 0x570   :  { %1814 = shalt.err (!%p1811_p9)
}
 0x571   :  { %1304 = dma.vmem_to_hbm [thread:$0]  %s1302_s0, 128, %s1986_s6, [#allocation4]  }
 0x572   :  { %1819 = dma.done.wait [#allocation4], 128  }
 0x573   :  { %1820 = vsyncadd [#allocation4], 4294967168 }
 0x574   :  { %1308 = vsyncpa [#allocation3], 1 }
 0x575   :  { %1309 = vsyncpa [#allocation6], 1 }
 0x576   :  { %1310 = vsyncpa [#allocation4], 1 }

</bundles_post_ra>
